<compile_context>
chip_gen: v5e
topology: v5e:2x2
jax: 0.10.0
libtpu: 0.0.40
codegen_flags: <defaults>
</compile_context>

<pallas_src>
import math
import functools

import jax
import jax.numpy as jnp
from jax.experimental import pallas as pl
from jax.experimental.pallas import tpu as pltpu

ENCODER_DIM = 32       # encoder_dims
NUM_HEADS = 4
MAX_TOTAL_LEN = 8      # number of inducing points (query length)
LN_EPS = 1e-5          # PyTorch LayerNorm default eps


def _isab_kernel(x_ref, qpk_ref, wkv_ref, wrff_ref, vec_ref, o_ref, *,
                 num_heads, m):
    TB, n, d = x_ref.shape
    h = num_heads
    hm = h * m

    x2 = x_ref[...].astype(jnp.float32).reshape(TB * n, d)          # (TB*n, d)
    q_exp = qpk_ref[0:hm, :].astype(jnp.float32)                    # (h*m, d) masked+scaled Q
    I = qpk_ref[hm:hm + m, :].astype(jnp.float32)                   # (m, d) inducing points
    headmask = qpk_ref[hm + m:hm + m + h, :].astype(jnp.float32)    # (h, d)
    vecs = vec_ref[...].astype(jnp.float32)                         # (7, d)

    # ---- K / V projections: two lane-aligned large-M dots ------------------
    K = jnp.dot(x2, wkv_ref[0].astype(jnp.float32),
                preferred_element_type=jnp.float32)                 # (TB*n, d)
    V = jnp.dot(x2, wkv_ref[1].astype(jnp.float32),
                preferred_element_type=jnp.float32)                 # (TB*n, d)

    # ---- scores: ONE non-batched matmul against the hoisted masked Q -------
    # s[b*n + j, hh*m + i] = <K[b,j,:], Q[i,:] * mask_hh> / sqrt(d)
    s = jax.lax.dot_general(K, q_exp, (((1,), (1,)), ((), ())),
                            preferred_element_type=jnp.float32)     # (TB*n, h*m)
    s = s.reshape(TB, n, hm)

    # single softmax over the key axis for all batches / heads / queries
    s = s - jnp.max(s, axis=1, keepdims=True)
    p = jnp.exp(s)
    p = p * pl.reciprocal(jnp.sum(p, axis=1, keepdims=True), approx=True)

    # ---- attention output: P^T @ V per batch, fused head selection ---------
    V3 = V.reshape(TB, n, d)
    o_full = jnp.einsum('bnq,bnd->bqd', p, V3,
                        preferred_element_type=jnp.float32)         # (TB, h*m, d)
    # keep each head's own d-slice; summing the disjoint masked head blocks
    # equals the reference concat-over-heads.
    attn = jnp.sum(o_full.reshape(TB, h, m, d) * headmask[None, :, None, :],
                   axis=1)                                          # (TB, m, d)

    # ---- residual + LayerNorm1 + RFF + residual + LayerNorm2 ---------------
    def layer_norm(z, w, bvec):
        mu = jnp.mean(z, axis=-1, keepdims=True)
        var = jnp.mean(jnp.square(z - mu), axis=-1, keepdims=True)
        return (z - mu) * jax.lax.rsqrt(var + LN_EPS) * w + bvec

    z = (I[None] + attn).reshape(TB * m, d)
    Hn = layer_norm(z, vecs[3:4], vecs[4:5])

    r = jnp.maximum(jnp.dot(Hn, wrff_ref[0].astype(jnp.float32),
                            preferred_element_type=jnp.float32) + vecs[0:1], 0.0)
    r = jnp.maximum(jnp.dot(r, wrff_ref[1].astype(jnp.float32),
                            preferred_element_type=jnp.float32) + vecs[1:2], 0.0)
    r = jnp.maximum(jnp.dot(r, wrff_ref[2].astype(jnp.float32),
                            preferred_element_type=jnp.float32) + vecs[2:3], 0.0)
    Hn = layer_norm(r + Hn, vecs[5:6], vecs[6:7])

    o_ref[...] = Hn.reshape(TB, m, d).astype(o_ref.dtype)


def isab_forward(x, params, *, block_b=None):
    """x: (b, n, d) float32 set elements. Returns (b, m, d)."""
    b, n, d = x.shape
    h = NUM_HEADS
    I = params["I"][0]                              # (m, d), broadcast over batch
    m = I.shape[0]
    dh = d // h

    # -- grid-invariant precompute (hoisted out of every grid step) ----------
    scale = 1.0 / math.sqrt(d)                      # PyTorch scales by sqrt(key_dim=encoder_dim)
    headmask = (jnp.arange(d)[None, :] // dh
                == jnp.arange(h)[:, None]).astype(jnp.float32)            # (h, d)
    Q = jnp.dot(I, params["wq"]) * scale                                   # (m, d)
    q_exp = (headmask[:, None, :] * Q[None, :, :]).reshape(h * m, d)       # (h*m, d)
    q_pack = jnp.concatenate([q_exp, I, headmask], axis=0)                 # (h*m+m+h, d)

    # leading-dim-indexed weight packs (no in-kernel lane-offset slicing)
    w_kv = jnp.stack([params["wk"], params["wv"]], axis=0)                 # (2, d, d)
    w_rff = jnp.stack([params["w1"], params["w2"], params["w3"]], axis=0)  # (3, d, d)
    vecs = jnp.concatenate([params["b1"], params["b2"], params["b3"],
                            params["ln1w"], params["ln1b"],
                            params["ln2w"], params["ln2b"]], axis=0)       # (7, d)

    if block_b is None:
        # rough fp32 working set per batch element: streamed x slab, K/V,
        # probs, head outputs, residual/LN/RFF temporaries + output.
        per_elem = 4 * (2 * n * d + 2 * n * d + n * h * m + h * m * d + 6 * m * d)
        budget = 24 << 20                  # conservative: also fits v7x's 64 MiB VMEM
        block_b = max(1, min(b, budget // max(per_elem, 1)))
        try:                               # split across TensorCores only when >1 core
            ncores = int(getattr(jax.devices()[0], "num_cores", 1) or 1)
        except Exception:
            ncores = 1
        if ncores > 1 and b > 1:
            block_b = min(block_b, -(-b // ncores))

    nsteps = pl.cdiv(b, block_b)
    b_pad = nsteps * block_b
    if b_pad != b:
        x = jnp.pad(x, ((0, b_pad - b), (0, 0), (0, 0)))

    kernel = functools.partial(_isab_kernel, num_heads=h, m=m)

    out = pl.pallas_call(
        kernel,
        out_shape=jax.ShapeDtypeStruct((b_pad, m, d), x.dtype),
        grid=(nsteps,),
        in_specs=[
            pl.BlockSpec((block_b, n, d), lambda i: (i, 0, 0)),    # x: per-step batch slab
            pl.BlockSpec((h * m + m + h, d), lambda i: (0, 0)),    # [q_exp | I | headmask]
            pl.BlockSpec((2, d, d), lambda i: (0, 0, 0)),          # [Wk ; Wv]
            pl.BlockSpec((3, d, d), lambda i: (0, 0, 0)),          # [W1 ; W2 ; W3]
            pl.BlockSpec((7, d), lambda i: (0, 0)),                # biases + LayerNorm params
        ],
        out_specs=pl.BlockSpec((block_b, m, d), lambda i: (i, 0, 0)),
        compiler_params=pltpu.CompilerParams(
            dimension_semantics=("parallel",),
            vmem_limit_bytes=48 << 20),
    )(x, q_pack, w_kv, w_rff, vecs)
    return out[:b]


def isab_reference(x, p):
    """Pure-JAX reference mirroring the PyTorch forward (for validation)."""
    b, _, d = x.shape
    I = jnp.broadcast_to(p["I"], (b,) + p["I"].shape[1:])
    Q = I @ p["wq"]
    K = x @ p["wk"]
    V = x @ p["wv"]
    Qh = jnp.stack(jnp.split(Q, NUM_HEADS, axis=2), 0)
    Kh = jnp.stack(jnp.split(K, NUM_HEADS, axis=2), 0)
    Vh = jnp.stack(jnp.split(V, NUM_HEADS, axis=2), 0)
    s = jnp.einsum("hbmd,hbnd->hbmn", Qh, Kh) / math.sqrt(d)
    pr = jax.nn.softmax(s, axis=-1)
    o = jnp.einsum("hbmn,hbnd->hbmd", pr, Vh)
    attn = jnp.concatenate(jnp.split(o, NUM_HEADS, 0), axis=3)[0]
    out = I + attn

    def ln(z, w, bia):
        mu = z.mean(-1, keepdims=True)
        var = ((z - mu) ** 2).mean(-1, keepdims=True)
        return (z - mu) / jnp.sqrt(var + LN_EPS) * w + bia

    H = ln(out, p["ln1w"], p["ln1b"])
    r = jnp.maximum(H @ p["w1"] + p["b1"], 0.0)
    r = jnp.maximum(r @ p["w2"] + p["b2"], 0.0)
    r = jnp.maximum(r @ p["w3"] + p["b3"], 0.0)
    H = r + H
    H = ln(H, p["ln2w"], p["ln2b"])
    return H


if __name__ == "__main__":
    b, n, d, m = 8, 16, ENCODER_DIM, MAX_TOTAL_LEN

    key = jax.random.PRNGKey(0)
    ks = jax.random.split(key, 12)
    sc = 1.0 / math.sqrt(d)

    params = {
        # inducing points, as in torch.randn(1, max_total_len, encoder_dim)
        "I":    jax.random.normal(ks[0], (1, m, d), jnp.float32),
        # attention projections (bias=False)
        "wq":   jax.random.normal(ks[1], (d, d), jnp.float32) * sc,
        "wk":   jax.random.normal(ks[2], (d, d), jnp.float32) * sc,
        "wv":   jax.random.normal(ks[3], (d, d), jnp.float32) * sc,
        # RFF: 3 x Linear(d, d) with bias
        "w1":   jax.random.normal(ks[4], (d, d), jnp.float32) * sc,
        "b1":   jax.random.normal(ks[5], (1, d), jnp.float32) * sc,
        "w2":   jax.random.normal(ks[6], (d, d), jnp.float32) * sc,
        "b2":   jax.random.normal(ks[7], (1, d), jnp.float32) * sc,
        "w3":   jax.random.normal(ks[8], (d, d), jnp.float32) * sc,
        "b3":   jax.random.normal(ks[9], (1, d), jnp.float32) * sc,
        # LayerNorms (PyTorch default init: weight=1, bias=0)
        "ln1w": jnp.ones((1, d), jnp.float32),
        "ln1b": jnp.zeros((1, d), jnp.float32),
        "ln2w": jnp.ones((1, d), jnp.float32),
        "ln2b": jnp.zeros((1, d), jnp.float32),
    }

    x = jax.random.normal(ks[10], (b, n, d), jnp.float32)

    out = jax.block_until_ready(isab_forward(x, params))

    ref = isab_reference(x, params)
    assert out.shape == (b, m, d), out.shape
    assert jnp.allclose(out, ref, atol=1e-2, rtol=1e-2), "mismatch vs JAX reference"

    print("KERNEL_OK")
</pallas_src>

<mosaic_0001>
module attributes {stable_mosaic.version = 11 : i64} {
  func.func @_isab_kernel(%arg0: i32, %arg1: memref<8x16x32xf32, #tpu.memory_space<vmem>>, %arg2: memref<44x32xf32, #tpu.memory_space<vmem>>, %arg3: memref<2x32x32xf32, #tpu.memory_space<vmem>>, %arg4: memref<3x32x32xf32, #tpu.memory_space<vmem>>, %arg5: memref<7x32xf32, #tpu.memory_space<vmem>>, %arg6: memref<8x8x32xf32, #tpu.memory_space<vmem>>) attributes {dimension_semantics = [#tpu.dimension_semantics<parallel>], iteration_bounds = array<i64: 1>, scalar_prefetch = 0 : i64, scratch_operands = 0 : i64, tpu.core_type = #tpu.core_type<tc>, window_params = [{transform_indices = @transform_0, window_bounds = array<i64: 8, 16, 32>}, {pipeline_mode = #tpu.pipeline_mode<synchronous>, transform_indices = @transform_1, window_bounds = array<i64: 44, 32>}, {pipeline_mode = #tpu.pipeline_mode<synchronous>, transform_indices = @transform_2, window_bounds = array<i64: 2, 32, 32>}, {pipeline_mode = #tpu.pipeline_mode<synchronous>, transform_indices = @transform_3, window_bounds = array<i64: 3, 32, 32>}, {pipeline_mode = #tpu.pipeline_mode<synchronous>, transform_indices = @transform_4, window_bounds = array<i64: 7, 32>}, {transform_indices = @transform_5, window_bounds = array<i64: 8, 8, 32>}]} {
    %c0 = arith.constant 0 : index
    %c0_0 = arith.constant 0 : index
    %c0_1 = arith.constant 0 : index
    %0 = vector.load %arg1[%c0, %c0_0, %c0_1] : memref<8x16x32xf32, #tpu.memory_space<vmem>>, vector<8x16x32xf32>
    %1 = vector.shape_cast %0 : vector<8x16x32xf32> to vector<128x32xf32>
    %c0_2 = arith.constant 0 : index
    %c0_3 = arith.constant 0 : index
    %2 = vector.load %arg2[%c0_2, %c0_3] : memref<44x32xf32, #tpu.memory_space<vmem>>, vector<32x32xf32>
    %c32 = arith.constant 32 : index
    %c0_4 = arith.constant 0 : index
    %3 = vector.load %arg2[%c32, %c0_4] : memref<44x32xf32, #tpu.memory_space<vmem>>, vector<8x32xf32>
    %c40 = arith.constant 40 : index
    %c0_5 = arith.constant 0 : index
    %4 = vector.load %arg2[%c40, %c0_5] : memref<44x32xf32, #tpu.memory_space<vmem>>, vector<4x32xf32>
    %c0_6 = arith.constant 0 : index
    %c0_7 = arith.constant 0 : index
    %5 = vector.load %arg5[%c0_6, %c0_7] : memref<7x32xf32, #tpu.memory_space<vmem>>, vector<7x32xf32>
    %c0_8 = arith.constant 0 : index
    %c0_9 = arith.constant 0 : index
    %c0_10 = arith.constant 0 : index
    %6 = vector.load %arg3[%c0_8, %c0_9, %c0_10] : memref<2x32x32xf32, #tpu.memory_space<vmem>>, vector<1x32x32xf32>
    %7 = vector.shape_cast %6 : vector<1x32x32xf32> to vector<32x32xf32>
    %cst = arith.constant dense<0.000000e+00> : vector<128x32xf32>
    %8 = tpu.matmul %1, %7, %cst {dimension_numbers = #tpu.dot_dimension_numbers<[1], [0], [0], [1], [0, 0, 1, 1], [], []>} : vector<128x32xf32>, vector<32x32xf32>, vector<128x32xf32> -> vector<128x32xf32>
    %c1 = arith.constant 1 : index
    %c0_11 = arith.constant 0 : index
    %c0_12 = arith.constant 0 : index
    %9 = vector.load %arg3[%c1, %c0_11, %c0_12] : memref<2x32x32xf32, #tpu.memory_space<vmem>>, vector<1x32x32xf32>
    %10 = vector.shape_cast %9 : vector<1x32x32xf32> to vector<32x32xf32>
    %cst_13 = arith.constant dense<0.000000e+00> : vector<128x32xf32>
    %11 = tpu.matmul %1, %10, %cst_13 {dimension_numbers = #tpu.dot_dimension_numbers<[1], [0], [0], [1], [0, 0, 1, 1], [], []>} : vector<128x32xf32>, vector<32x32xf32>, vector<128x32xf32> -> vector<128x32xf32>
    %cst_14 = arith.constant dense<0.000000e+00> : vector<128x32xf32>
    %12 = tpu.matmul %8, %2, %cst_14 {dimension_numbers = #tpu.dot_dimension_numbers<[1], [1], [0], [0], [0, 0, 1, 0], [], []>} : vector<128x32xf32>, vector<32x32xf32>, vector<128x32xf32> -> vector<128x32xf32>
    %13 = vector.shape_cast %12 : vector<128x32xf32> to vector<8x16x32xf32>
    %cst_15 = arith.constant dense<0xFF800000> : vector<8x32xf32>
    %14 = vector.multi_reduction <maximumf>, %13, %cst_15 [1] : vector<8x16x32xf32> to vector<8x32xf32>
    %15 = vector.shape_cast %14 : vector<8x32xf32> to vector<8x1x32xf32>
    %16 = vector.broadcast %15 : vector<8x1x32xf32> to vector<8x16x32xf32>
    %17 = arith.subf %13, %16 : vector<8x16x32xf32>
    %18 = math.exp %17 : vector<8x16x32xf32>
    %cst_16 = arith.constant dense<0.000000e+00> : vector<8x32xf32>
    %19 = vector.multi_reduction <add>, %18, %cst_16 [1] : vector<8x16x32xf32> to vector<8x32xf32>
    %20 = vector.shape_cast %19 : vector<8x32xf32> to vector<8x1x32xf32>
    %21 = tpu.reciprocal %20 {approx = true} : vector<8x1x32xf32> -> vector<8x1x32xf32>
    %22 = vector.broadcast %21 : vector<8x1x32xf32> to vector<8x16x32xf32>
    %23 = arith.mulf %18, %22 : vector<8x16x32xf32>
    %24 = vector.shape_cast %11 : vector<128x32xf32> to vector<8x16x32xf32>
    "tpu.trace_start"() <{level = 10 : i32, message = "bnq,bnd->bqd"}> : () -> ()
    %cst_17 = arith.constant dense<0.000000e+00> : vector<8x32x32xf32>
    %25 = tpu.matmul %23, %24, %cst_17 {dimension_numbers = #tpu.dot_dimension_numbers<[1], [1], [2], [2], [0, 0, 0, 2, 1, 2], [0], [0]>} : vector<8x16x32xf32>, vector<8x16x32xf32>, vector<8x32x32xf32> -> vector<8x32x32xf32>
    "tpu.trace_stop"() : () -> ()
    %26 = vector.shape_cast %25 : vector<8x32x32xf32> to vector<8x4x8x32xf32>
    %27 = vector.shape_cast %4 : vector<4x32xf32> to vector<1x4x1x32xf32>
    %28 = vector.broadcast %27 : vector<1x4x1x32xf32> to vector<8x4x8x32xf32>
    %29 = arith.mulf %26, %28 : vector<8x4x8x32xf32>
    %cst_18 = arith.constant dense<0.000000e+00> : vector<8x8x32xf32>
    %30 = vector.multi_reduction <add>, %29, %cst_18 [1] : vector<8x4x8x32xf32> to vector<8x8x32xf32>
    %31 = vector.shape_cast %3 : vector<8x32xf32> to vector<1x8x32xf32>
    %32 = vector.broadcast %31 : vector<1x8x32xf32> to vector<8x8x32xf32>
    %33 = arith.addf %32, %30 : vector<8x8x32xf32>
    %34 = vector.shape_cast %33 : vector<8x8x32xf32> to vector<64x32xf32>
    %35 = vector.extract_strided_slice %5 {offsets = [3, 0], sizes = [1, 32], strides = [1, 1]} : vector<7x32xf32> to vector<1x32xf32>
    %36 = vector.extract_strided_slice %5 {offsets = [4, 0], sizes = [1, 32], strides = [1, 1]} : vector<7x32xf32> to vector<1x32xf32>
    %cst_19 = arith.constant dense<0.000000e+00> : vector<64xf32>
    %37 = vector.multi_reduction <add>, %34, %cst_19 [1] : vector<64x32xf32> to vector<64xf32>
    %38 = vector.shape_cast %37 : vector<64xf32> to vector<64x1xf32>
    %cst_20 = arith.constant 3.200000e+01 : f32
    %39 = vector.broadcast %cst_20 : f32 to vector<64x1xf32>
    %40 = arith.divf %38, %39 : vector<64x1xf32>
    %41 = vector.broadcast %40 : vector<64x1xf32> to vector<64x32xf32>
    %42 = arith.subf %34, %41 : vector<64x32xf32>
    %43 = arith.mulf %42, %42 : vector<64x32xf32>
    %cst_21 = arith.constant dense<0.000000e+00> : vector<64xf32>
    %44 = vector.multi_reduction <add>, %43, %cst_21 [1] : vector<64x32xf32> to vector<64xf32>
    %45 = vector.shape_cast %44 : vector<64xf32> to vector<64x1xf32>
    %cst_22 = arith.constant 3.200000e+01 : f32
    %46 = vector.broadcast %cst_22 : f32 to vector<64x1xf32>
    %47 = arith.divf %45, %46 : vector<64x1xf32>
    %48 = vector.broadcast %40 : vector<64x1xf32> to vector<64x32xf32>
    %49 = arith.subf %34, %48 : vector<64x32xf32>
    %cst_23 = arith.constant 9.99999974E-6 : f32
    %50 = vector.broadcast %cst_23 : f32 to vector<64x1xf32>
    %51 = arith.addf %47, %50 : vector<64x1xf32>
    %52 = math.rsqrt %51 : vector<64x1xf32>
    %53 = vector.broadcast %52 : vector<64x1xf32> to vector<64x32xf32>
    %54 = arith.mulf %49, %53 : vector<64x32xf32>
    %55 = vector.broadcast %35 : vector<1x32xf32> to vector<64x32xf32>
    %56 = arith.mulf %54, %55 : vector<64x32xf32>
    %57 = vector.broadcast %36 : vector<1x32xf32> to vector<64x32xf32>
    %58 = arith.addf %56, %57 : vector<64x32xf32>
    %c0_24 = arith.constant 0 : index
    %c0_25 = arith.constant 0 : index
    %c0_26 = arith.constant 0 : index
    %59 = vector.load %arg4[%c0_24, %c0_25, %c0_26] : memref<3x32x32xf32, #tpu.memory_space<vmem>>, vector<1x32x32xf32>
    %60 = vector.shape_cast %59 : vector<1x32x32xf32> to vector<32x32xf32>
    %cst_27 = arith.constant dense<0.000000e+00> : vector<64x32xf32>
    %61 = tpu.matmul %58, %60, %cst_27 {dimension_numbers = #tpu.dot_dimension_numbers<[1], [0], [0], [1], [0, 0, 1, 1], [], []>} : vector<64x32xf32>, vector<32x32xf32>, vector<64x32xf32> -> vector<64x32xf32>
    %62 = vector.extract_strided_slice %5 {offsets = [0, 0], sizes = [1, 32], strides = [1, 1]} : vector<7x32xf32> to vector<1x32xf32>
    %63 = vector.broadcast %62 : vector<1x32xf32> to vector<64x32xf32>
    %64 = arith.addf %61, %63 : vector<64x32xf32>
    %cst_28 = arith.constant 0.000000e+00 : f32
    %65 = vector.broadcast %cst_28 : f32 to vector<64x32xf32>
    %66 = arith.maximumf %64, %65 : vector<64x32xf32>
    %c1_29 = arith.constant 1 : index
    %c0_30 = arith.constant 0 : index
    %c0_31 = arith.constant 0 : index
    %67 = vector.load %arg4[%c1_29, %c0_30, %c0_31] : memref<3x32x32xf32, #tpu.memory_space<vmem>>, vector<1x32x32xf32>
    %68 = vector.shape_cast %67 : vector<1x32x32xf32> to vector<32x32xf32>
    %cst_32 = arith.constant dense<0.000000e+00> : vector<64x32xf32>
    %69 = tpu.matmul %66, %68, %cst_32 {dimension_numbers = #tpu.dot_dimension_numbers<[1], [0], [0], [1], [0, 0, 1, 1], [], []>} : vector<64x32xf32>, vector<32x32xf32>, vector<64x32xf32> -> vector<64x32xf32>
    %70 = vector.extract_strided_slice %5 {offsets = [1, 0], sizes = [1, 32], strides = [1, 1]} : vector<7x32xf32> to vector<1x32xf32>
    %71 = vector.broadcast %70 : vector<1x32xf32> to vector<64x32xf32>
    %72 = arith.addf %69, %71 : vector<64x32xf32>
    %cst_33 = arith.constant 0.000000e+00 : f32
    %73 = vector.broadcast %cst_33 : f32 to vector<64x32xf32>
    %74 = arith.maximumf %72, %73 : vector<64x32xf32>
    %c2 = arith.constant 2 : index
    %c0_34 = arith.constant 0 : index
    %c0_35 = arith.constant 0 : index
    %75 = vector.load %arg4[%c2, %c0_34, %c0_35] : memref<3x32x32xf32, #tpu.memory_space<vmem>>, vector<1x32x32xf32>
    %76 = vector.shape_cast %75 : vector<1x32x32xf32> to vector<32x32xf32>
    %cst_36 = arith.constant dense<0.000000e+00> : vector<64x32xf32>
    %77 = tpu.matmul %74, %76, %cst_36 {dimension_numbers = #tpu.dot_dimension_numbers<[1], [0], [0], [1], [0, 0, 1, 1], [], []>} : vector<64x32xf32>, vector<32x32xf32>, vector<64x32xf32> -> vector<64x32xf32>
    %78 = vector.extract_strided_slice %5 {offsets = [2, 0], sizes = [1, 32], strides = [1, 1]} : vector<7x32xf32> to vector<1x32xf32>
    %79 = vector.broadcast %78 : vector<1x32xf32> to vector<64x32xf32>
    %80 = arith.addf %77, %79 : vector<64x32xf32>
    %cst_37 = arith.constant 0.000000e+00 : f32
    %81 = vector.broadcast %cst_37 : f32 to vector<64x32xf32>
    %82 = arith.maximumf %80, %81 : vector<64x32xf32>
    %83 = arith.addf %82, %58 : vector<64x32xf32>
    %84 = vector.extract_strided_slice %5 {offsets = [5, 0], sizes = [1, 32], strides = [1, 1]} : vector<7x32xf32> to vector<1x32xf32>
    %85 = vector.extract_strided_slice %5 {offsets = [6, 0], sizes = [1, 32], strides = [1, 1]} : vector<7x32xf32> to vector<1x32xf32>
    %cst_38 = arith.constant dense<0.000000e+00> : vector<64xf32>
    %86 = vector.multi_reduction <add>, %83, %cst_38 [1] : vector<64x32xf32> to vector<64xf32>
    %87 = vector.shape_cast %86 : vector<64xf32> to vector<64x1xf32>
    %cst_39 = arith.constant 3.200000e+01 : f32
    %88 = vector.broadcast %cst_39 : f32 to vector<64x1xf32>
    %89 = arith.divf %87, %88 : vector<64x1xf32>
    %90 = vector.broadcast %89 : vector<64x1xf32> to vector<64x32xf32>
    %91 = arith.subf %83, %90 : vector<64x32xf32>
    %92 = arith.mulf %91, %91 : vector<64x32xf32>
    %cst_40 = arith.constant dense<0.000000e+00> : vector<64xf32>
    %93 = vector.multi_reduction <add>, %92, %cst_40 [1] : vector<64x32xf32> to vector<64xf32>
    %94 = vector.shape_cast %93 : vector<64xf32> to vector<64x1xf32>
    %cst_41 = arith.constant 3.200000e+01 : f32
    %95 = vector.broadcast %cst_41 : f32 to vector<64x1xf32>
    %96 = arith.divf %94, %95 : vector<64x1xf32>
    %97 = vector.broadcast %89 : vector<64x1xf32> to vector<64x32xf32>
    %98 = arith.subf %83, %97 : vector<64x32xf32>
    %cst_42 = arith.constant 9.99999974E-6 : f32
    %99 = vector.broadcast %cst_42 : f32 to vector<64x1xf32>
    %100 = arith.addf %96, %99 : vector<64x1xf32>
    %101 = math.rsqrt %100 : vector<64x1xf32>
    %102 = vector.broadcast %101 : vector<64x1xf32> to vector<64x32xf32>
    %103 = arith.mulf %98, %102 : vector<64x32xf32>
    %104 = vector.broadcast %84 : vector<1x32xf32> to vector<64x32xf32>
    %105 = arith.mulf %103, %104 : vector<64x32xf32>
    %106 = vector.broadcast %85 : vector<1x32xf32> to vector<64x32xf32>
    %107 = arith.addf %105, %106 : vector<64x32xf32>
    %108 = vector.shape_cast %107 : vector<64x32xf32> to vector<8x8x32xf32>
    %c0_43 = arith.constant 0 : index
    %c0_44 = arith.constant 0 : index
    %c0_45 = arith.constant 0 : index
    %109 = vector.load %arg6[%c0_43, %c0_44, %c0_45] : memref<8x8x32xf32, #tpu.memory_space<vmem>>, vector<8x8x32xf32>
    tpu.vector_store %arg6[%c0_43, %c0_44, %c0_45], %108 {strides = array<i32>} : memref<8x8x32xf32, #tpu.memory_space<vmem>>, vector<8x8x32xf32>,
    return
  }
  func.func @transform_0(%arg0: i32) -> (i32, i32, i32) {
    %c0_i32 = arith.constant 0 : i32
    %c0_i32_0 = arith.constant 0 : i32
    %c0_i32_1 = arith.constant 0 : i32
    return %arg0, %c0_i32, %c0_i32_0 : i32, i32, i32
  }
  func.func @transform_1(%arg0: i32) -> (i32, i32) {
    %c0_i32 = arith.constant 0 : i32
    %c0_i32_0 = arith.constant 0 : i32
    %c0_i32_1 = arith.constant 0 : i32
    return %c0_i32, %c0_i32_0 : i32, i32
  }
  func.func @transform_2(%arg0: i32) -> (i32, i32, i32) {
    %c0_i32 = arith.constant 0 : i32
    %c0_i32_0 = arith.constant 0 : i32
    %c0_i32_1 = arith.constant 0 : i32
    %c0_i32_2 = arith.constant 0 : i32
    return %c0_i32, %c0_i32_0, %c0_i32_1 : i32, i32, i32
  }
  func.func @transform_3(%arg0: i32) -> (i32, i32, i32) {
    %c0_i32 = arith.constant 0 : i32
    %c0_i32_0 = arith.constant 0 : i32
    %c0_i32_1 = arith.constant 0 : i32
    %c0_i32_2 = arith.constant 0 : i32
    return %c0_i32, %c0_i32_0, %c0_i32_1 : i32, i32, i32
  }
  func.func @transform_4(%arg0: i32) -> (i32, i32) {
    %c0_i32 = arith.constant 0 : i32
    %c0_i32_0 = arith.constant 0 : i32
    %c0_i32_1 = arith.constant 0 : i32
    return %c0_i32, %c0_i32_0 : i32, i32
  }
  func.func @transform_5(%arg0: i32) -> (i32, i32, i32) {
    %c0_i32 = arith.constant 0 : i32
    %c0_i32_0 = arith.constant 0 : i32
    %c0_i32_1 = arith.constant 0 : i32
    return %arg0, %c0_i32, %c0_i32_0 : i32, i32, i32
  }
}

</mosaic_0001>

<bundles_post_ra>
// kernel: tpu_custom_call.1
= control target key start
LH: loop header
LB: loop body
LE: loop exit
PB: predicated region body
PF: predicated region fallthrough
CT: control target
= control target key end

     0   :  { %10 = vsyncpa [#allocation3], 0  ;;  %s2922_s0 = inlined_call_operand.hbm [shape: f32[8,16,32], index: 0, kind: input, shape index: {}]   ;;  %s2923_s1 = inlined_call_operand.vmem [shape: f32[44,32], index: 1, kind: input, shape index: {}]   ;;  %s2924_s2 = inlined_call_operand.vmem [shape: f32[2,32,32], index: 2, kind: input, shape index: {}]   ;;  %s2925_s3 = inlined_call_operand.hbm [shape: f32[3,32,32], index: 3, kind: input, shape index: {}]   ;;  %s2926_s4 = inlined_call_operand.vmem [shape: f32[7,32], index: 4, kind: input, shape index: {}]   ;;  %s2927_s5 = inlined_call_operand.hbm [shape: f32[8,8,32], index: 5, kind: output, shape index: {}]  }
   0x1   :  { %11 = vsyncpa [#allocation6], 0 }
   0x2   :  { %12 = vsyncpa [#allocation4], 0  ;;  %s17_s20 = sshll.u32 %s2922_s0, 4  ;;  %s2250_s21 = smov [#allocation2]   ;;  %s18_s20 = int_to_ptr.hbm [resolvable:$true] %s17_s20 }
   0x3   :  { %s19_s22 = sshll.u32 %s2250_s21, 4  ;;  %s34_s25 = sshll.u32 %s2925_s3, 4  ;;  %s20_s22 = int_to_ptr.vmem [resolvable:$true] %s19_s22  ;;  %s35_s25 = int_to_ptr.hbm [resolvable:$true] %s34_s25 }
   0x4   :  { %s2251_s26 = smov 128   ;;  %s2252_s27 = smov 8  }
   0x5   :  { %25 = dma.hbm_to_vmem [thread:$0]  %s18_s20, 2048, %s20_s22, [#allocation3], %s2251_s26, %s2251_s26, %s2252_s27  }
   0x6   :  { %s2253_s28 = smov [#allocation5]  }
   0x7   :  { %s36_s29 = sshll.u32 %s2253_s28, 4  ;;  %s37_s29 = int_to_ptr.vmem [resolvable:$true] %s36_s29 }
   0x8   :  { %42 = dma.hbm_to_vmem [thread:$0]  %s35_s25, 1536, %s37_s29, [#allocation6], %s2251_s26, %s2251_s26, %s2252_s27  }
   0x9   :  { %2244 = dma.done.wait [#allocation3], 2048  }
   0xa   :  { %2245 = vsyncadd [#allocation3], 4294965248 }
   0xb   :  { %2246 = dma.done.wait [#allocation6], 1536  }
   0xc   :  { %2247 = vsyncadd [#allocation6], 4294965760  ;;  %v79_v0 = vld [vmem:[%s2924_s2 + $0x18] sm:$0xff]  ;;  %v78_v1 = vld [vmem:[%s2924_s2 + $0x10] sm:$0xff]  ;;  %vm80_vm0 = vcmask 261120   ;;  %vm637_vm1 = vcmask 130048  }
   0xd   :  { %141 = vmatpush.msra.mxu0 %v79_v0  ;;  %v77_v2 = vld [vmem:[%s2924_s2 + $0x8] sm:$0xff]  ;;  %v76_v3 = vld [vmem:[%s2924_s2] sm:$0xff]  ;;  %v2318_v6 = vld [vmem:[#allocation2 + $0x10] sm:$0xff]  ;;  %s1951_s9 = sshll.u32 %s2927_s5, 4  ;;  %s1952_s9 = int_to_ptr.hbm [resolvable:$true] %s1951_s9 }
   0xe   :  { %v2310_v4 = vld [vmem:[#allocation2] sm:$0xff]  ;;  %v2314_v5 = vld [vmem:[#allocation2 + $0x8] sm:$0xff]  ;;  %v2322_v7 = vld [vmem:[#allocation2 + $0x18] sm:$0xff] }
   0xf   :  { %142 = vmatpush.msra.mxu0 %v78_v1  ;;  %v2326_v8 = vld [vmem:[#allocation2 + $0x20] sm:$0xff]  ;;  %v2330_v9 = vld [vmem:[#allocation2 + $0x28] sm:$0xff]  ;;  %v2334_v10 = vld [vmem:[#allocation2 + $0x30] sm:$0xff] }
  0x10   :  { %v2338_v11 = vld [vmem:[#allocation2 + $0x38] sm:$0xff]  ;;  %v2342_v12 = vld [vmem:[#allocation2 + $0x40] sm:$0xff]  ;;  %v2346_v13 = vld [vmem:[#allocation2 + $0x48] sm:$0xff] }
  0x11   :  { %143 = vmatpush.msra.mxu0 %v77_v2  ;;  %v72_v14 = vld [vmem:[%s2923_s1 + $0x18] sm:$0xff]  ;;  %v2354_v15 = vld [vmem:[#allocation2 + $0x50] sm:$0xff]  ;;  %v70_v17 = vld [vmem:[%s2923_s1 + $0x8] sm:$0xff] }
  0x12   :  { %2001 = vmatpush.xpose.msk.msra.mxu2 %vm80_vm0, %v72_v14  ;;  %v71_v16 = vld [vmem:[%s2923_s1 + $0x10] sm:$0xff]  ;;  %v2365_v18 = vld [vmem:[#allocation2 + $0x58] sm:$0xff]  ;;  %v69_v19 = vld [vmem:[%s2923_s1] sm:$0xff] }
  0x13   :  { %144 = vmatpush.msra.mxu0 %v76_v3  ;;  %v2374_v20 = vld [vmem:[#allocation2 + $0x60] sm:$0xff]  ;;  %v2378_v21 = vld [vmem:[#allocation2 + $0x68] sm:$0xff]  ;;  %v2382_v22 = vld [vmem:[#allocation2 + $0x70] sm:$0xff] }
  0x14   :  { %1965 = vmatmul.msk.f32.vlgmr.msra.gmra.mxu0 %vm80_vm0, %v2310_v4  ;;  %v2386_v23 = vld [vmem:[#allocation2 + $0x78] sm:$0xff]  ;;  %v1983_v37 = vld [vmem:[%s2924_s2 + $0x30] sm:$0xff]  ;;  %v1982_v38 = vld [vmem:[%s2924_s2 + $0x28] sm:$0xff] }
  0x15   :  { %v1984_v34 = vld [vmem:[%s2924_s2 + $0x38] sm:$0xff]  ;;  %v1981_v39 = vld [vmem:[%s2924_s2 + $0x20] sm:$0xff] }
  0x16   :  { %2002 = vmatpush.xpose.msk.msra.mxu2 %vm80_vm0, %v71_v16  ;;  %211 = vmatpush.msrb.mxu0 %v1984_v34 }
  0x17   :  { %2077 = vmatpush.msra.mxu1 %v1984_v34 }
  0x18   :  { %212 = vmatpush.msrb.mxu0 %v1983_v37 }
  0x19   :  { %2078 = vmatpush.msra.mxu1 %v1983_v37 }
  0x1a   :  { %2003 = vmatpush.xpose.msk.msra.mxu2 %vm80_vm0, %v70_v17  ;;  %213 = vmatpush.msrb.mxu0 %v1982_v38 }
  0x1b   :  { %2079 = vmatpush.msra.mxu1 %v1982_v38 }
  0x1c   :  { %1966 = vmatmul.msk.f32.gmra.mxu0 %vm80_vm0, %v2314_v5 }
  0x1d   :  { %2080 = vmatpush.msra.mxu1 %v1981_v39  ;;  %214 = vmatpush.msrb.mxu0 %v1981_v39 }
  0x1e   :  { %2004 = vmatpush.xpose.msk.msra.mxu2 %vm80_vm0, %v69_v19  ;;  %1986 = vmatmul.msk.f32.vlgmr.msra.gmra.mxu1 %vm80_vm0, %v2314_v5 }
  0x24   :  { %1967 = vmatmul.msk.f32.gmra.mxu0 %vm80_vm0, %v2318_v6 }
  0x26   :  { %1987 = vmatmul.msk.f32.gmra.mxu1 %vm80_vm0, %v2318_v6 }
  0x2c   :  { %1968 = vmatmul.msk.f32.gmra.mxu0 %vm80_vm0, %v2322_v7 }
  0x2e   :  { %1988 = vmatmul.msk.f32.gmra.mxu1 %vm80_vm0, %v2322_v7 }
  0x34   :  { %1969 = vmatmul.msk.f32.gmra.mxu0 %vm80_vm0, %v2326_v8 }
  0x36   :  { %1989 = vmatmul.msk.f32.gmra.mxu1 %vm80_vm0, %v2326_v8 }
  0x3c   :  { %1970 = vmatmul.msk.f32.gmra.mxu0 %vm80_vm0, %v2330_v9 }
  0x3e   :  { %1990 = vmatmul.msk.f32.gmra.mxu1 %vm80_vm0, %v2330_v9 }
  0x44   :  { %1971 = vmatmul.msk.f32.gmra.mxu0 %vm80_vm0, %v2334_v10 }
  0x46   :  { %1991 = vmatmul.msk.f32.gmra.mxu1 %vm80_vm0, %v2334_v10 }
  0x4c   :  { %1972 = vmatmul.msk.f32.gmra.mxu0 %vm80_vm0, %v2338_v11 }
  0x4e   :  { %1992 = vmatmul.msk.f32.gmra.mxu1 %vm80_vm0, %v2338_v11 }
  0x54   :  { %1973 = vmatmul.msk.f32.gmra.mxu0 %vm80_vm0, %v2342_v12 }
  0x56   :  { %1993 = vmatmul.msk.f32.gmra.mxu1 %vm80_vm0, %v2342_v12 }
  0x5c   :  { %1974 = vmatmul.msk.f32.gmra.mxu0 %vm80_vm0, %v2346_v13 }
  0x5e   :  { %1994 = vmatmul.msk.f32.gmra.mxu1 %vm80_vm0, %v2346_v13 }
  0x64   :  { %1975 = vmatmul.msk.f32.gmra.mxu0 %vm80_vm0, %v2354_v15 }
  0x66   :  { %1995 = vmatmul.msk.f32.gmra.mxu1 %vm80_vm0, %v2354_v15 }
  0x6c   :  { %1976 = vmatmul.msk.f32.gmra.mxu0 %vm80_vm0, %v2365_v18 }
  0x6e   :  { %1996 = vmatmul.msk.f32.gmra.mxu1 %vm80_vm0, %v2365_v18 }
  0x74   :  { %1977 = vmatmul.msk.f32.gmra.mxu0 %vm80_vm0, %v2374_v20 }
  0x76   :  { %1997 = vmatmul.msk.f32.gmra.mxu1 %vm80_vm0, %v2374_v20 }
  0x7c   :  { %1978 = vmatmul.msk.f32.gmra.mxu0 %vm80_vm0, %v2378_v21 }
  0x7e   :  { %1998 = vmatmul.msk.f32.gmra.mxu1 %vm80_vm0, %v2378_v21 }
  0x84   :  { %1979 = vmatmul.msk.f32.gmra.mxu0 %vm80_vm0, %v2382_v22 }
  0x86   :  { %1999 = vmatmul.msk.f32.gmra.mxu1 %vm80_vm0, %v2382_v22 }
  0x8c   :  { %1980 = vmatmul.msk.f32.gmra.mxu0 %vm80_vm0, %v2386_v23 }
  0x8e   :  { %2000 = vmatmul.msk.f32.gmra.mxu1 %vm80_vm0, %v2386_v23 }
  0x91   :  { %v146_v24 = vpop.f32.mrf.mxu0 }
  0x92   :  { %2005 = vmatmul.msk.f32.vlgmr.msra.gmra.mxu2 %vm80_vm0, %v146_v24 }
  0x94   :  { %1985 = vmatmul.msk.f32.vlgmr.msrb.gmra.mxu0 %vm80_vm0, %v2310_v4 }
  0x99   :  { %v149_v25 = vpop.f32.mrf.mxu0 }
  0x9a   :  { %2006 = vmatmul.msk.f32.gmra.mxu2 %vm80_vm0, %v149_v25 }
  0xa1   :  { %v152_v26 = vpop.f32.mrf.mxu0 }
  0xa2   :  { %2007 = vmatmul.msk.f32.gmra.mxu2 %vm80_vm0, %v152_v26 }
  0xa9   :  { %v155_v27 = vpop.f32.mrf.mxu0 }
  0xaa   :  { %2008 = vmatmul.msk.f32.gmra.mxu2 %vm80_vm0, %v155_v27 }
  0xb1   :  { %v158_v28 = vpop.f32.mrf.mxu0 }
  0xb2   :  { %2009 = vmatmul.msk.f32.gmra.mxu2 %vm80_vm0, %v158_v28 }
  0xb9   :  { %v161_v29 = vpop.f32.mrf.mxu0 }
  0xba   :  { %2010 = vmatmul.msk.f32.gmra.mxu2 %vm80_vm0, %v161_v29 }
  0xc1   :  { %v164_v30 = vpop.f32.mrf.mxu0 }
  0xc2   :  { %2011 = vmatmul.msk.f32.gmra.mxu2 %vm80_vm0, %v164_v30 }
  0xc9   :  { %v167_v31 = vpop.f32.mrf.mxu0 }
  0xca   :  { %2012 = vmatmul.msk.f32.gmra.mxu2 %vm80_vm0, %v167_v31 }
  0xd1   :  { %v170_v32 = vpop.f32.mrf.mxu0 }
  0xd2   :  { %2013 = vmatmul.msk.f32.gmra.mxu2 %vm80_vm0, %v170_v32 }
  0xd9   :  { %v173_v33 = vpop.f32.mrf.mxu0 }
  0xda   :  { %2014 = vmatmul.msk.f32.gmra.mxu2 %vm80_vm0, %v173_v33 }
  0xe1   :  { %v176_v35 = vpop.f32.mrf.mxu0 }
  0xe2   :  { %2015 = vmatmul.msk.f32.gmra.mxu2 %vm80_vm0, %v176_v35 }
  0xe9   :  { %v179_v36 = vpop.f32.mrf.mxu0 }
  0xea   :  { %2016 = vmatmul.msk.f32.gmra.mxu2 %vm80_vm0, %v179_v36 }
  0xf1   :  { %v182_v40 = vpop.f32.mrf.mxu0 }
  0xf2   :  { %2017 = vmatmul.msk.f32.gmra.mxu2 %vm80_vm0, %v182_v40 }
  0xf9   :  { %v185_v41 = vpop.f32.mrf.mxu0 }
  0xfa   :  { %2018 = vmatmul.msk.f32.gmra.mxu2 %vm80_vm0, %v185_v41 }
 0x101   :  { %v188_v42 = vpop.f32.mrf.mxu0 }
 0x102   :  { %2019 = vmatmul.msk.f32.gmra.mxu2 %vm80_vm0, %v188_v42 }
 0x109   :  { %v191_v43 = vpop.f32.mrf.mxu0 }
 0x10a   :  { %2020 = vmatmul.msk.f32.gmra.mxu2 %vm80_vm0, %v191_v43 }
 0x115   :  { %v341_v44 = vpop.f32.mrf.mxu2 }
 0x116   :  { %v389_v46 = vsel %vm80_vm0, %v341_v44, -inf }
 0x11d   :  { %v344_v45 = vpop.f32.mrf.mxu2 }
 0x11e   :  { %v390_v47 = vsel %vm80_vm0, %v344_v45, -inf }
 0x11f   :  { %v391_v48 = vmax.f32 %v389_v46, %v390_v47 }
 0x121   :  { %v392_v49 = vrot.slane %v391_v48, 4 }
 0x123   :  { %v393_v50 = vmax.f32 %v391_v48, %v392_v49 }
 0x125   :  { %v394_v51 = vrot.slane %v393_v50, 2  ;;  %v347_v52 = vpop.f32.mrf.mxu2 }
 0x126   :  { %v398_v56 = vsel %vm80_vm0, %v347_v52, -inf }
 0x127   :  { %v395_v53 = vmax.f32 %v393_v50, %v394_v51 }
 0x129   :  { %v396_v54 = vrot.slane %v395_v53, 1 }
 0x12b   :  { %v397_v55 = vmax.f32 %v395_v53, %v396_v54 }
 0x12d   :  { %v461_v57 = vsub.f32 %v341_v44, %v397_v55  ;;  %v462_v58 = vsub.f32 %v344_v45, %v397_v55  ;;  %v350_v59 = vpop.f32.mrf.mxu2 }
 0x12e   :  { %v399_v60 = vsel %vm80_vm0, %v350_v59, -inf }
 0x12f   :  { %v477_v61 = vmul.f32 1.442695, %v461_v57  ;;  %v479_v62 = vmul.f32 1.442695, %v462_v58  ;;  %v400_v63 = vmax.f32 %v398_v56, %v399_v60 }
 0x131   :  { %2090 = vpow2.f32 %v477_v61  ;;  %v401_v0 = vrot.slane %v400_v63, 4 }
 0x132   :  { %2092 = vpow2.f32 %v479_v62 }
 0x133   :  { %v402_v1 = vmax.f32 %v400_v63, %v401_v0 }
 0x135   :  { %v403_v2 = vrot.slane %v402_v1, 2  ;;  %v353_v3 = vpop.f32.mrf.mxu2 }
 0x136   :  { %v407_v13 = vsel %vm80_vm0, %v353_v3, -inf }
 0x137   :  { %v2091_v4 = vpop.eup %2090  ;;  %v404_v5 = vmax.f32 %v402_v1, %v403_v2 }
 0x138   :  { %v2442_v6 = vpop.eup %2092  ;;  %v509_v7 = vsel %vm80_vm0, %v2091_v4, 0.0 }
 0x139   :  { %v510_v8 = vsel %vm80_vm0, %v2442_v6, 0.0  ;;  %v405_v9 = vrot.slane %v404_v5, 1 }
 0x13a   :  { %v511_v10 = vadd.f32 %v510_v8, %v509_v7 }
 0x13b   :  { %v406_v11 = vmax.f32 %v404_v5, %v405_v9 }
 0x13c   :  { %v512_v12 = vrot.slane %v511_v10, 4 }
 0x13d   :  { %v463_v14 = vsub.f32 %v347_v52, %v406_v11  ;;  %v464_v16 = vsub.f32 %v350_v59, %v406_v11  ;;  %v356_v17 = vpop.f32.mrf.mxu2 }
 0x13e   :  { %v408_v19 = vsel %vm80_vm0, %v356_v17, -inf  ;;  %v513_v24 = vadd.f32 %v512_v12, %v511_v10 }
 0x13f   :  { %v481_v25 = vmul.f32 1.442695, %v463_v14  ;;  %v483_v26 = vmul.f32 1.442695, %v464_v16  ;;  %v409_v27 = vmax.f32 %v407_v13, %v408_v19 }
 0x140   :  { %v514_v28 = vrot.slane %v513_v24, 2 }
 0x141   :  { %2094 = vpow2.f32 %v481_v25  ;;  %v410_v15 = vrot.slane %v409_v27, 4 }
 0x142   :  { %2096 = vpow2.f32 %v483_v26  ;;  %v515_v29 = vadd.f32 %v514_v28, %v513_v24 }
 0x143   :  { %v411_v30 = vmax.f32 %v409_v27, %v410_v15 }
 0x144   :  { %v516_v31 = vrot.slane %v515_v29, 1 }
 0x145   :  { %v412_v32 = vrot.slane %v411_v30, 2  ;;  %v359_v33 = vpop.f32.mrf.mxu2 }
 0x146   :  { %v517_v34 = vadd.f32 %v516_v31, %v515_v29  ;;  %v416_v43 = vsel %vm80_vm0, %v359_v33, -inf }
 0x147   :  { %v2095_v35 = vpop.eup %2094  ;;  %v413_v36 = vmax.f32 %v411_v30, %v412_v32 }
 0x148   :  { %v2453_v37 = vpop.eup %2096  ;;  %v518_v38 = vsel %vm80_vm0, %v2095_v35, 0.0  ;;  %2098 = vrcp.f32 %v517_v34 }
 0x149   :  { %v519_v18 = vsel %vm80_vm0, %v2453_v37, 0.0  ;;  %v414_v39 = vrot.slane %v413_v36, 1 }
 0x14a   :  { %v520_v40 = vadd.f32 %v519_v18, %v518_v38 }
 0x14b   :  { %v415_v41 = vmax.f32 %v413_v36, %v414_v39 }
 0x14c   :  { %v521_v42 = vrot.slane %v520_v40, 4 }
 0x14d   :  { %v465_v44 = vsub.f32 %v353_v3, %v415_v41  ;;  %v466_v45 = vsub.f32 %v356_v17, %v415_v41  ;;  %v362_v46 = vpop.f32.mrf.mxu2 }
 0x14e   :  { %v2099_v47 = vpop.eup %2098  ;;  %v417_v48 = vsel %vm80_vm0, %v362_v46, -inf  ;;  %v522_v49 = vadd.f32 %v521_v42, %v520_v40 }
 0x14f   :  { %v485_v50 = vmul.f32 1.442695, %v465_v44  ;;  %v487_v51 = vmul.f32 1.442695, %v466_v45  ;;  %v418_v52 = vmax.f32 %v416_v43, %v417_v48  ;;  %v589_v20 = vmul.f32 %v2099_v47, %v2091_v4 }
 0x150   :  { %v523_v53 = vrot.slane %v522_v49, 2  ;;  %v590_v63 = vmul.f32 %v2099_v47, %v2442_v6 }
 0x151   :  { %2100 = vpow2.f32 %v485_v50  ;;  %v419_v54 = vrot.slane %v418_v52, 4  ;;  %605 = vxpose.xlu0.b32.start [1/2] (short) (narrow) %v589_v20, 32 }
 0x152   :  { %2102 = vpow2.f32 %v487_v51  ;;  %v524_v55 = vadd.f32 %v523_v53, %v522_v49 }
 0x153   :  { %v420_v56 = vmax.f32 %v418_v52, %v419_v54 }
 0x154   :  { %v525_v57 = vrot.slane %v524_v55, 1 }
 0x155   :  { %v421_v58 = vrot.slane %v420_v56, 2  ;;  %v365_v59 = vpop.f32.mrf.mxu2 }
 0x156   :  { %v526_v60 = vadd.f32 %v525_v57, %v524_v55  ;;  %v425_v7 = vsel %vm80_vm0, %v365_v59, -inf }
 0x157   :  { %v2101_v61 = vpop.eup %2100  ;;  %v422_v62 = vmax.f32 %v420_v56, %v421_v58 }
 0x158   :  { %v2465_v0 = vpop.eup %2102  ;;  %v527_v1 = vsel %vm80_vm0, %v2101_v61, 0.0  ;;  %2104 = vrcp.f32 %v526_v60 }
 0x159   :  { %v528_v21 = vsel %vm80_vm0, %v2465_v0, 0.0  ;;  %v423_v2 = vrot.slane %v422_v62, 1  ;;  %606 = vxpose.xlu0.b32.end [2/2] (short) (narrow) %v590_v63, 32 }
 0x15a   :  { %v529_v3 = vadd.f32 %v528_v21, %v527_v1 }
 0x15b   :  { %v424_v4 = vmax.f32 %v422_v62, %v423_v2 }
 0x15c   :  { %v530_v5 = vrot.slane %v529_v3, 4 }
 0x15d   :  { %v467_v8 = vsub.f32 %v359_v33, %v424_v4  ;;  %v468_v6 = vsub.f32 %v362_v46, %v424_v4  ;;  %v368_v9 = vpop.f32.mrf.mxu2 }
 0x15e   :  { %v2105_v10 = vpop.eup %2104  ;;  %v426_v11 = vsel %vm80_vm0, %v368_v9, -inf  ;;  %v531_v12 = vadd.f32 %v530_v5, %v529_v3 }
 0x15f   :  { %v489_v13 = vmul.f32 1.442695, %v467_v8  ;;  %v491_v14 = vmul.f32 1.442695, %v468_v6  ;;  %v427_v22 = vmax.f32 %v425_v7, %v426_v11  ;;  %v591_v16 = vmul.f32 %v2105_v10, %v2095_v35 }
 0x160   :  { %v532_v17 = vrot.slane %v531_v12, 2  ;;  %v592_v31 = vmul.f32 %v2105_v10, %v2453_v37 }
 0x161   :  { %2106 = vpow2.f32 %v489_v13  ;;  %v428_v19 = vrot.slane %v427_v22, 4  ;;  %679 = vxpose.xlu1.b32.start [1/2] (short) (narrow) %v591_v16, 32 }
 0x162   :  { %2108 = vpow2.f32 %v491_v14  ;;  %v533_v24 = vadd.f32 %v532_v17, %v531_v12 }
 0x163   :  { %v429_v25 = vmax.f32 %v427_v22, %v428_v19 }
 0x164   :  { %v534_v26 = vrot.slane %v533_v24, 1 }
 0x165   :  { %v430_v27 = vrot.slane %v429_v25, 2  ;;  %v371_v28 = vpop.f32.mrf.mxu2 }
 0x166   :  { %v535_v15 = vadd.f32 %v534_v26, %v533_v24  ;;  %v434_v18 = vsel %vm80_vm0, %v371_v28, -inf }
 0x167   :  { %v2107_v29 = vpop.eup %2106  ;;  %v431_v30 = vmax.f32 %v429_v25, %v430_v27 }
 0x168   :  { %v2477_v32 = vpop.eup %2108  ;;  %v536_v33 = vsel %vm80_vm0, %v2107_v29, 0.0  ;;  %2110 = vrcp.f32 %v535_v15 }
 0x169   :  { %v537_v23 = vsel %vm80_vm0, %v2477_v32, 0.0  ;;  %v432_v34 = vrot.slane %v431_v30, 1  ;;  %680 = vxpose.xlu1.b32.end [2/2] (short) (narrow) %v592_v31, 32 }
 0x16a   :  { %v538_v35 = vadd.f32 %v537_v23, %v536_v33 }
 0x16b   :  { %v433_v36 = vmax.f32 %v431_v30, %v432_v34 }
 0x16c   :  { %v539_v38 = vrot.slane %v538_v35, 4 }
 0x16d   :  { %v469_v39 = vsub.f32 %v365_v59, %v433_v36  ;;  %v470_v40 = vsub.f32 %v368_v9, %v433_v36  ;;  %v374_v41 = vpop.f32.mrf.mxu2 }
 0x16e   :  { %v2111_v42 = vpop.eup %2110  ;;  %v540_v37 = vadd.f32 %v539_v38, %v538_v35  ;;  %v435_v43 = vsel %vm80_vm0, %v374_v41, -inf }
 0x16f   :  { %v493_v44 = vmul.f32 1.442695, %v469_v39  ;;  %v495_v45 = vmul.f32 1.442695, %v470_v40  ;;  %v436_v46 = vmax.f32 %v434_v18, %v435_v43  ;;  %v593_v47 = vmul.f32 %v2111_v42, %v2101_v61  ;;  %v219_v39 = vpop.f32.mrf.mxu1  ;;  %v216_v43 = vpop.f32.mrf.mxu0 }
 0x170   :  { %v541_v48 = vrot.slane %v540_v37, 2  ;;  %v594_v57 = vmul.f32 %v2111_v42, %v2465_v0  ;;  %664 = vmatpush.msra.mxu0 %v219_v39  ;;  %2081 = vmatpush.msra.mxu3 %v219_v39 }
 0x171   :  { %2112 = vpow2.f32 %v493_v44  ;;  %v437_v49 = vrot.slane %v436_v46, 4  ;;  %752 = vxpose.xlu2.b32.start [1/2] (short) (narrow) %v593_v47, 32 }
 0x172   :  { %2114 = vpow2.f32 %v495_v45  ;;  %v542_v50 = vadd.f32 %v541_v48, %v540_v37  ;;  %2082 = vmatpush.msra.mxu3 %v216_v43  ;;  %665 = vmatpush.msra.mxu0 %v216_v43 }
 0x173   :  { %v438_v51 = vmax.f32 %v436_v46, %v437_v49 }
 0x174   :  { %v543_v52 = vrot.slane %v542_v50, 1 }
 0x175   :  { %v439_v20 = vrot.slane %v438_v51, 2  ;;  %v377_v53 = vpop.f32.mrf.mxu2 }
 0x176   :  { %v544_v54 = vadd.f32 %v543_v52, %v542_v50  ;;  %v443_v21 = vsel %vm80_vm0, %v377_v53, -inf }
 0x177   :  { %v2113_v55 = vpop.eup %2112  ;;  %v440_v56 = vmax.f32 %v438_v51, %v439_v20  ;;  %v222_v50 = vpop.f32.mrf.mxu1 }
 0x178   :  { %v2485_v58 = vpop.eup %2114  ;;  %v545_v59 = vsel %vm80_vm0, %v2113_v55, 0.0  ;;  %2116 = vrcp.f32 %v544_v54 }
 0x179   :  { %v546_v60 = vsel %vm80_vm0, %v2485_v58, 0.0  ;;  %v441_v61 = vrot.slane %v440_v56, 1  ;;  %753 = vxpose.xlu2.b32.end [2/2] (short) (narrow) %v594_v57, 32 }
 0x17a   :  { %v547_v62 = vadd.f32 %v546_v60, %v545_v59 }
 0x17b   :  { %v442_v63 = vmax.f32 %v440_v56, %v441_v61 }
 0x17c   :  { %v548_v1 = vrot.slane %v547_v62, 4 }
 0x17d   :  { %v471_v2 = vsub.f32 %v371_v28, %v442_v63  ;;  %v472_v3 = vsub.f32 %v374_v41, %v442_v63  ;;  %v380_v4 = vpop.f32.mrf.mxu2 }
 0x17e   :  { %v2117_v5 = vpop.eup %2116  ;;  %v549_v0 = vadd.f32 %v548_v1, %v547_v62  ;;  %v444_v7 = vsel %vm80_vm0, %v380_v4, -inf }
 0x17f   :  { %v497_v8 = vmul.f32 1.442695, %v471_v2  ;;  %v499_v6 = vmul.f32 1.442695, %v472_v3  ;;  %v445_v9 = vmax.f32 %v443_v21, %v444_v7  ;;  %v595_v10 = vmul.f32 %v2117_v5, %v2107_v29  ;;  %v225_v2 = vpop.f32.mrf.mxu1 }
 0x180   :  { %v550_v11 = vrot.slane %v549_v0, 2  ;;  %v596_v26 = vmul.f32 %v2117_v5, %v2477_v32  ;;  %737 = vmatpush.msrb.mxu3 %v225_v2 }
 0x181   :  { %2118 = vpow2.f32 %v497_v8  ;;  %v446_v12 = vrot.slane %v445_v9, 4  ;;  %825 = vxpose.xlu0.b32.start [1/2] (short) (narrow) %v595_v10, 32 }
 0x182   :  { %2120 = vpow2.f32 %v499_v6  ;;  %v551_v13 = vadd.f32 %v550_v11, %v549_v0  ;;  %738 = vmatpush.msrb.mxu3 %v222_v50 }
 0x183   :  { %v447_v14 = vmax.f32 %v445_v9, %v446_v12 }
 0x184   :  { %v552_v22 = vrot.slane %v551_v13, 1 }
 0x185   :  { %v448_v16 = vrot.slane %v447_v14, 2  ;;  %v383_v17 = vpop.f32.mrf.mxu2 }
 0x186   :  { %v553_v19 = vadd.f32 %v552_v22, %v551_v13  ;;  %v452_v23 = vsel %vm80_vm0, %v383_v17, -inf }
 0x187   :  { %v2119_v24 = vpop.eup %2118  ;;  %v449_v25 = vmax.f32 %v447_v14, %v448_v16  ;;  %v228_v8 = vpop.f32.mrf.mxu1 }
 0x188   :  { %v2493_v27 = vpop.eup %2120  ;;  %v554_v28 = vsel %vm80_vm0, %v2119_v24, 0.0  ;;  %2122 = vrcp.f32 %v553_v19 }
 0x189   :  { %v555_v15 = vsel %vm80_vm0, %v2493_v27, 0.0  ;;  %v450_v29 = vrot.slane %v449_v25, 1  ;;  %826 = vxpose.xlu0.b32.end [2/2] (short) (narrow) %v596_v26, 32 }
 0x18a   :  { %v556_v30 = vadd.f32 %v555_v15, %v554_v28 }
 0x18b   :  { %v451_v31 = vmax.f32 %v449_v25, %v450_v29 }
 0x18c   :  { %v557_v33 = vrot.slane %v556_v30, 4 }
 0x18d   :  { %v473_v34 = vsub.f32 %v377_v53, %v451_v31  ;;  %v474_v35 = vsub.f32 %v380_v4, %v451_v31  ;;  %v386_v36 = vpop.f32.mrf.mxu2 }
 0x18e   :  { %v2123_v38 = vpop.eup %2122  ;;  %v558_v32 = vadd.f32 %v557_v33, %v556_v30  ;;  %v453_v18 = vsel %vm80_vm0, %v386_v36, -inf }
 0x18f   :  { %v501_v40 = vmul.f32 1.442695, %v473_v34  ;;  %v503_v41 = vmul.f32 1.442695, %v474_v35  ;;  %v454_v42 = vmax.f32 %v452_v23, %v453_v18  ;;  %v597_v37 = vmul.f32 %v2123_v38, %v2113_v55  ;;  %v231_v19 = vpop.f32.mrf.mxu1 }
 0x190   :  { %v559_v44 = vrot.slane %v558_v32, 2  ;;  %v598_v53 = vmul.f32 %v2123_v38, %v2485_v58 }
 0x191   :  { %2124 = vpow2.f32 %v501_v40  ;;  %v455_v45 = vrot.slane %v454_v42, 4  ;;  %898 = vxpose.xlu2.b32.start [1/2] (short) (narrow) %v597_v37, 32 }
 0x192   :  { %2126 = vpow2.f32 %v503_v41  ;;  %v560_v46 = vadd.f32 %v559_v44, %v558_v32 }
 0x193   :  { %v456_v47 = vmax.f32 %v454_v42, %v455_v45 }
 0x194   :  { %v561_v48 = vrot.slane %v560_v46, 1 }
 0x195   :  { %v457_v49 = vrot.slane %v456_v47, 2 }
 0x196   :  { %v562_v51 = vadd.f32 %v561_v48, %v560_v46 }
 0x197   :  { %v2125_v52 = vpop.eup %2124  ;;  %v458_v20 = vmax.f32 %v456_v47, %v457_v49  ;;  %v234_v15 = vpop.f32.mrf.mxu1 }
 0x198   :  { %v2127_v54 = vpop.eup %2126  ;;  %v563_v55 = vsel %vm80_vm0, %v2125_v52, 0.0  ;;  %2128 = vrcp.f32 %v562_v51 }
 0x199   :  { %v564_v56 = vsel %vm80_vm0, %v2127_v54, 0.0  ;;  %v459_v57 = vrot.slane %v458_v20, 1  ;;  %899 = vxpose.xlu2.b32.end [2/2] (short) (narrow) %v598_v53, 32 }
 0x19a   :  { %v565_v59 = vadd.f32 %v564_v56, %v563_v55 }
 0x19b   :  { %v460_v60 = vmax.f32 %v458_v20, %v459_v57 }
 0x19c   :  { %v566_v61 = vrot.slane %v565_v59, 4 }
 0x19d   :  { %v475_v62 = vsub.f32 %v383_v17, %v460_v60  ;;  %v476_v63 = vsub.f32 %v386_v36, %v460_v60 }
 0x19e   :  { %v2129_v1 = vpop.eup %2128  ;;  %v567_v21 = vadd.f32 %v566_v61, %v565_v59 }
 0x19f   :  { %v505_v3 = vmul.f32 1.442695, %v475_v62  ;;  %v507_v4 = vmul.f32 1.442695, %v476_v63  ;;  %v599_v5 = vmul.f32 %v2129_v1, %v2119_v24  ;;  %v600_v10 = vmul.f32 %v2129_v1, %v2493_v27  ;;  %v237_v31 = vpop.f32.mrf.mxu1 }
 0x1a0   :  { %v568_v58 = vrot.slane %v567_v21, 2 }
 0x1a1   :  { %2130 = vpow2.f32 %v505_v3  ;;  %971 = vxpose.xlu1.b32.start [1/2] (short) (narrow) %v599_v5, 32 }
 0x1a2   :  { %2132 = vpow2.f32 %v507_v4  ;;  %v569_v0 = vadd.f32 %v568_v58, %v567_v21  ;;  %v74_v58 = vld [vmem:[%s2923_s1 + $0x28] sm:$0xf] }
 0x1a4   :  { %v570_v7 = vrot.slane %v569_v0, 1 }
 0x1a6   :  { %v571_v6 = vadd.f32 %v570_v7, %v569_v0 }
 0x1a7   :  { %v2131_v9 = vpop.eup %2130  ;;  %v240_v23 = vpop.f32.mrf.mxu1 }
 0x1a8   :  { %v2133_v11 = vpop.eup %2132  ;;  %v572_v12 = vsel %vm80_vm0, %v2131_v9, 0.0  ;;  %2134 = vrcp.f32 %v571_v6  ;;  %v1192_v6 = vrot.slane %v74_v58, 2 }
 0x1a9   :  { %v573_v13 = vsel %vm80_vm0, %v2133_v11, 0.0  ;;  %972 = vxpose.xlu1.b32.end [2/2] (short) (narrow) %v600_v10, 32  ;;  %v2542_v10 = vperm.slane %v74_v58, 0 }
 0x1aa   :  { %v574_v14 = vadd.f32 %v573_v13, %v572_v12 }
 0x1ac   :  { %v575_v22 = vrot.slane %v574_v14, 4 }
 0x1ae   :  { %v2135_v16 = vpop.eup %2134  ;;  %v576_v17 = vadd.f32 %v575_v22, %v574_v14  ;;  %v1193_v22 = vrot.slane %v74_v58, 3 }
 0x1af   :  { %v601_v24 = vmul.f32 %v2135_v16, %v2125_v52  ;;  %v602_v27 = vmul.f32 %v2135_v16, %v2127_v54  ;;  %v243_v35 = vpop.f32.mrf.mxu1 }
 0x1b0   :  { %v577_v25 = vrot.slane %v576_v17, 2 }
 0x1b1   :  { %1044 = vxpose.xlu0.b32.start [1/2] (short) (narrow) %v601_v24, 32 }
 0x1b2   :  { %v578_v26 = vadd.f32 %v577_v25, %v576_v17  ;;  %v2551_v25 = vperm.slane %v1193_v22, 0 }
 0x1b4   :  { %v579_v28 = vrot.slane %v578_v26, 1 }
 0x1b6   :  { %v580_v29 = vadd.f32 %v579_v28, %v578_v26 }
 0x1b7   :  { %v246_v36 = vpop.f32.mrf.mxu1 }
 0x1b8   :  { %2136 = vrcp.f32 %v580_v29 }
 0x1b9   :  { %1045 = vxpose.xlu0.b32.end [2/2] (short) (narrow) %v602_v27, 32 }
 0x1be   :  { %v2137_v30 = vpop.eup %2136 }
 0x1bf   :  { %v603_v33 = vmul.f32 %v2137_v30, %v2131_v9  ;;  %v604_v34 = vmul.f32 %v2137_v30, %v2133_v11  ;;  %v249_v38 = vpop.f32.mrf.mxu1  ;;  %v2544_v11 = vperm.slane %v1192_v6, 0 }
 0x1c0   :  { %1029 = vmatpush.msrb.mxu2 %v249_v38 }
 0x1c1   :  { %1117 = vxpose.xlu1.b32.start [1/2] (short) (narrow) %v603_v33, 32  ;;  %v2560_v33 = vld [vmem:[%s2923_s1 + $0x20] sm:$0xff] }
 0x1c2   :  { %1030 = vmatpush.msrb.mxu2 %v246_v36 }
 0x1c7   :  { %v252_v32 = vpop.f32.mrf.mxu1 }
 0x1c9   :  { %1118 = vxpose.xlu1.b32.end [2/2] (short) (narrow) %v604_v34, 32 }
 0x1cf   :  { %v255_v18 = vpop.f32.mrf.mxu1 }
 0x1d0   :  { %1102 = vmatpush.msrb.mxu1 %v255_v18 }
 0x1d2   :  { %1103 = vmatpush.msrb.mxu1 %v252_v32 }
 0x1d7   :  { %v258_v50 = vpop.f32.mrf.mxu1 }
 0x1df   :  { %v261_v51 = vpop.f32.mrf.mxu1 }
 0x1e0   :  { %1175 = vmatpush.msra.mxu2 %v261_v51 }
 0x1e2   :  { %1176 = vmatpush.msra.mxu2 %v258_v50 }
 0x1f5   :  { %v621_v39 = vpop.trf.xlu0 }
 0x1f6   :  { %2021 = vmatmul.msk.f32.vlgmr.msra.gmra.mxu0 %vm637_vm1, %v621_v39 }
 0x1fd   :  { %v622_v40 = vpop.trf.xlu0 }
 0x1fe   :  { %2022 = vmatmul.msk.f32.vlgmr.msra.gmra.mxu3 %vm637_vm1, %v622_v40 }
 0x1ff   :  { %810 = vmatpush.msra.mxu3 %v231_v19 }
 0x201   :  { %811 = vmatpush.msra.mxu3 %v228_v8  ;;  %v1191_v8 = vrot.slane %v74_v58, 1 }
 0x203   :  { %v2539_v9 = vperm.slane %v1191_v8, 0 }
 0x205   :  { %v623_v41 = vpop.trf.xlu0  ;;  %v695_v37 = vpop.trf.xlu1 }
 0x206   :  { %2023 = vmatmul.msk.f32.gmra.mxu3 %vm637_vm1, %v623_v41 }
 0x20a   :  { %v768_v46 = vpop.trf.xlu2 }
 0x20d   :  { %v624_v42 = vpop.trf.xlu0  ;;  %v696_v43 = vpop.trf.xlu1 }
 0x20e   :  { %2024 = vmatmul.msk.f32.gmra.mxu3 %vm637_vm1, %v624_v42 }
 0x212   :  { %v769_v48 = vpop.trf.xlu2 }
 0x215   :  { %v697_v44 = vpop.trf.xlu1 }
 0x216   :  { %2025 = vmatmul.msk.f32.vlgmr.msrb.gmra.mxu3 %vm637_vm1, %v695_v37 }
 0x217   :  { %883 = vmatpush.msrb.mxu3 %v237_v31 }
 0x219   :  { %884 = vmatpush.msrb.mxu3 %v234_v15 }
 0x21a   :  { %v770_v52 = vpop.trf.xlu2 }
 0x21d   :  { %v698_v45 = vpop.trf.xlu1 }
 0x21e   :  { %2026 = vmatmul.msk.f32.gmra.mxu3 %vm637_vm1, %v696_v43 }
 0x222   :  { %v771_v54 = vpop.trf.xlu2 }
 0x225   :  { %v841_v47 = vpop.trf.xlu0 }
 0x226   :  { %2027 = vmatmul.msk.f32.gmra.mxu3 %vm637_vm1, %v697_v44 }
 0x22a   :  { %v914_v1 = vpop.trf.xlu2 }
 0x22d   :  { %v842_v49 = vpop.trf.xlu0 }
 0x22e   :  { %2028 = vmatmul.msk.f32.gmra.mxu3 %vm637_vm1, %v698_v45 }
 0x232   :  { %v915_v4 = vpop.trf.xlu2 }
 0x235   :  { %v843_v20 = vpop.trf.xlu0 }
 0x236   :  { %2029 = vmatmul.msk.f32.vlgmr.msra.gmra.mxu3 %vm637_vm1, %v768_v46 }
 0x237   :  { %956 = vmatpush.msra.mxu3 %v243_v35 }
 0x239   :  { %957 = vmatpush.msra.mxu3 %v240_v23 }
 0x23a   :  { %v916_v7 = vpop.trf.xlu2 }
 0x23d   :  { %v844_v55 = vpop.trf.xlu0 }
 0x23e   :  { %2030 = vmatmul.msk.f32.gmra.mxu3 %vm637_vm1, %v769_v48 }
 0x242   :  { %v917_v16 = vpop.trf.xlu2 }
 0x245   :  { %v987_v53 = vpop.trf.xlu1 }
 0x246   :  { %2031 = vmatmul.msk.f32.gmra.mxu3 %vm637_vm1, %v770_v52  ;;  %2041 = vmatmul.msk.f32.vlgmr.msrb.gmra.mxu2 %vm637_vm1, %v987_v53 }
 0x24d   :  { %v988_v56 = vpop.trf.xlu1 }
 0x24e   :  { %2032 = vmatmul.msk.f32.gmra.mxu3 %vm637_vm1, %v771_v54  ;;  %2042 = vmatmul.msk.f32.gmra.mxu2 %vm637_vm1, %v988_v56 }
 0x255   :  { %v989_v57 = vpop.trf.xlu1  ;;  %v1060_v59 = vpop.trf.xlu0 }
 0x256   :  { %2033 = vmatmul.msk.f32.vlgmr.msrb.gmra.mxu3 %vm637_vm1, %v841_v47  ;;  %2043 = vmatmul.msk.f32.gmra.mxu2 %vm637_vm1, %v989_v57 }
 0x257   :  { %2045 = vmatmul.msk.f32.vlgmr.msrb.gmra.mxu1 %vm637_vm1, %v1060_v59 }
 0x25d   :  { %v990_v60 = vpop.trf.xlu1  ;;  %v1061_v61 = vpop.trf.xlu0 }
 0x25e   :  { %2034 = vmatmul.msk.f32.gmra.mxu3 %vm637_vm1, %v842_v49  ;;  %2044 = vmatmul.msk.f32.gmra.mxu2 %vm637_vm1, %v990_v60 }
 0x25f   :  { %2046 = vmatmul.msk.f32.gmra.mxu1 %vm637_vm1, %v1061_v61 }
 0x265   :  { %v1062_v62 = vpop.trf.xlu0  ;;  %v1133_v63 = vpop.trf.xlu1 }
 0x266   :  { %2035 = vmatmul.msk.f32.gmra.mxu3 %vm637_vm1, %v843_v20  ;;  %2049 = vmatmul.msk.f32.vlgmr.msra.gmra.mxu2 %vm637_vm1, %v1133_v63 }
 0x267   :  { %2047 = vmatmul.msk.f32.gmra.mxu1 %vm637_vm1, %v1062_v62 }
 0x26d   :  { %v1063_v21 = vpop.trf.xlu0  ;;  %v1134_v2 = vpop.trf.xlu1 }
 0x26e   :  { %2036 = vmatmul.msk.f32.gmra.mxu3 %vm637_vm1, %v844_v55  ;;  %2050 = vmatmul.msk.f32.gmra.mxu2 %vm637_vm1, %v1134_v2 }
 0x26f   :  { %2048 = vmatmul.msk.f32.gmra.mxu1 %vm637_vm1, %v1063_v21 }
 0x273   :  { %v667_v12 = vpop.f32.mrf.mxu0 }
 0x274   :  { %v1202_v17 = vmul.f32 %v2542_v10, %v667_v12 }
 0x275   :  { %v1135_v3 = vpop.trf.xlu1 }
 0x276   :  { %2037 = vmatmul.msk.f32.vlgmr.msra.gmra.mxu3 %vm637_vm1, %v914_v1  ;;  %2051 = vmatmul.msk.f32.gmra.mxu2 %vm637_vm1, %v1135_v3  ;;  %v1234_v26 = vsel %vm80_vm0, %v1202_v17, 0.0 }
 0x27d   :  { %v1136_v5 = vpop.trf.xlu1 }
 0x27e   :  { %2038 = vmatmul.msk.f32.gmra.mxu3 %vm637_vm1, %v915_v4  ;;  %2052 = vmatmul.msk.f32.gmra.mxu2 %vm637_vm1, %v1136_v5 }
 0x281   :  { %v670_v0 = vpop.f32.mrf.mxu3 }
 0x282   :  { %v1203_v14 = vmul.f32 %v2539_v9, %v670_v0 }
 0x284   :  { %v1235_v24 = vsel %vm80_vm0, %v1203_v14, 0.0 }
 0x285   :  { %v1236_v15 = vadd.f32 %v1235_v24, %v1234_v26 }
 0x286   :  { %2039 = vmatmul.msk.f32.gmra.mxu3 %vm637_vm1, %v916_v7 }
 0x289   :  { %v673_v13 = vpop.f32.mrf.mxu3 }
 0x28a   :  { %v1204_v19 = vmul.f32 %v2544_v11, %v673_v13 }
 0x28c   :  { %v1237_v28 = vsel %vm80_vm0, %v1204_v19, 0.0 }
 0x28d   :  { %v1238_v30 = vadd.f32 %v1237_v28, %v1236_v15 }
 0x28e   :  { %2040 = vmatmul.msk.f32.gmra.mxu3 %vm637_vm1, %v917_v16 }
 0x291   :  { %v676_v29 = vpop.f32.mrf.mxu3 }
 0x292   :  { %v1205_v27 = vmul.f32 %v2551_v25, %v676_v29 }
 0x294   :  { %v1239_v31 = vsel %vm80_vm0, %v1205_v27, 0.0 }
 0x295   :  { %v1240_v23 = vadd.f32 %v1239_v31, %v1238_v30 }
 0x297   :  { %v2563_v34 = vadd.f32 %v1240_v23, %v2560_v33 }
 0x299   :  { %v740_v35 = vpop.f32.mrf.mxu3  ;;  %v1298_v36 = vsel %vm80_vm0, %v2563_v34, 0.0 }
 0x29a   :  { %1299 = vadd.xlane.f32.xlu2 %v1298_v36  ;;  %v1206_v39 = vmul.f32 %v2542_v10, %v740_v35 }
 0x29c   :  { %v1241_v42 = vsel %vm80_vm0, %v1206_v39, 0.0 }
 0x2a1   :  { %v743_v38 = vpop.f32.mrf.mxu3 }
 0x2a2   :  { %v1207_v18 = vmul.f32 %v2539_v9, %v743_v38 }
 0x2a4   :  { %v1242_v41 = vsel %vm80_vm0, %v1207_v18, 0.0 }
 0x2a5   :  { %v1243_v43 = vadd.f32 %v1242_v41, %v1241_v42 }
 0x2a9   :  { %v746_v32 = vpop.f32.mrf.mxu3 }
 0x2aa   :  { %v1208_v40 = vmul.f32 %v2544_v11, %v746_v32 }
 0x2ac   :  { %v1244_v37 = vsel %vm80_vm0, %v1208_v40, 0.0 }
 0x2ad   :  { %v1245_v46 = vadd.f32 %v1244_v37, %v1243_v43 }
 0x2b1   :  { %v749_v44 = vpop.f32.mrf.mxu3 }
 0x2b2   :  { %v1209_v45 = vmul.f32 %v2551_v25, %v749_v44 }
 0x2b4   :  { %v1246_v47 = vsel %vm80_vm0, %v1209_v45, 0.0 }
 0x2b5   :  { %v1247_v48 = vadd.f32 %v1246_v47, %v1245_v46 }
 0x2b7   :  { %v2576_v49 = vadd.f32 %v1247_v48, %v2560_v33 }
 0x2b9   :  { %v813_v50 = vpop.f32.mrf.mxu3  ;;  %v1301_v51 = vsel %vm80_vm0, %v2576_v49, 0.0 }
 0x2ba   :  { %1302 = vadd.xlane.f32.xlu0 %v1301_v51  ;;  %v1210_v55 = vmul.f32 %v2542_v10, %v813_v50 }
 0x2bc   :  { %v1248_v59 = vsel %vm80_vm0, %v1210_v55, 0.0 }
 0x2c1   :  { %v816_v52 = vpop.f32.mrf.mxu3 }
 0x2c2   :  { %v1211_v54 = vmul.f32 %v2539_v9, %v816_v52 }
 0x2c4   :  { %v1249_v57 = vsel %vm80_vm0, %v1211_v54, 0.0 }
 0x2c5   :  { %v1250_v61 = vadd.f32 %v1249_v57, %v1248_v59 }
 0x2c9   :  { %v819_v20 = vpop.f32.mrf.mxu3  ;;  %v1032_v53 = vpop.f32.mrf.mxu2 }
 0x2ca   :  { %v1212_v56 = vmul.f32 %v2544_v11, %v819_v20  ;;  %v1222_v5 = vmul.f32 %v2542_v10, %v1032_v53 }
 0x2cc   :  { %v1251_v60 = vsel %vm80_vm0, %v1212_v56, 0.0  ;;  %v1269_v12 = vsel %vm80_vm0, %v1222_v5, 0.0 }
 0x2cd   :  { %v1252_v21 = vadd.f32 %v1251_v60, %v1250_v61 }
 0x2d1   :  { %v822_v62 = vpop.f32.mrf.mxu3  ;;  %v1035_v63 = vpop.f32.mrf.mxu2 }
 0x2d2   :  { %v1213_v1 = vmul.f32 %v2551_v25, %v822_v62  ;;  %v1223_v58 = vmul.f32 %v2539_v9, %v1035_v63 }
 0x2d4   :  { %v1253_v2 = vsel %vm80_vm0, %v1213_v1, 0.0  ;;  %v1105_v3 = vpop.f32.mrf.mxu1  ;;  %v1270_v13 = vsel %vm80_vm0, %v1223_v58, 0.0 }
 0x2d5   :  { %v1254_v4 = vadd.f32 %v1253_v2, %v1252_v21  ;;  %v1271_v16 = vadd.f32 %v1270_v13, %v1269_v12  ;;  %v1226_v19 = vmul.f32 %v2542_v10, %v1105_v3 }
 0x2d7   :  { %v2591_v0 = vadd.f32 %v1254_v4, %v2560_v33  ;;  %v1276_v31 = vsel %vm80_vm0, %v1226_v19, 0.0  ;;  %v2254_v4 = vmov 32.0  }
 0x2d8   :  { %2138 = vrcp.f32 %v2254_v4 }
 0x2d9   :  { %v886_v7 = vpop.f32.mrf.mxu3  ;;  %v1038_v8 = vpop.f32.mrf.mxu2  ;;  %v1304_v6 = vsel %vm80_vm0, %v2591_v0, 0.0 }
 0x2da   :  { %v1224_v14 = vmul.f32 %v2544_v11, %v1038_v8  ;;  %1305 = vadd.xlane.f32.xlu1 %v1304_v6  ;;  %v1214_v37 = vmul.f32 %v2542_v10, %v886_v7 }
 0x2dc   :  { %v1108_v22 = vpop.f32.mrf.mxu1  ;;  %v1272_v17 = vsel %vm80_vm0, %v1224_v14, 0.0  ;;  %v1255_v50 = vsel %vm80_vm0, %v1214_v37, 0.0 }
 0x2dd   :  { %v1273_v24 = vadd.f32 %v1272_v17, %v1271_v16  ;;  %v1227_v26 = vmul.f32 %v2539_v9, %v1108_v22 }
 0x2de   :  { %v2139_v12 = vpop.eup %2138 }
 0x2df   :  { %v1277_v23 = vsel %vm80_vm0, %v1227_v26, 0.0  ;;  %v1323_v17 = vmul.f32 32.0, %v2139_v12  ;;  %vm1327_vm2 = vweird.f32 %v2139_v12 }
 0x2e0   :  { %v1278_v32 = vadd.f32 %v1277_v23, %v1276_v31 }
 0x2e1   :  { %v889_v28 = vpop.f32.mrf.mxu3  ;;  %v1041_v15 = vpop.f32.mrf.mxu2  ;;  %v1324_v26 = vsub.f32 1.0, %v1323_v17 }
 0x2e2   :  { %v1225_v29 = vmul.f32 %v2551_v25, %v1041_v15  ;;  %v1215_v42 = vmul.f32 %v2539_v9, %v889_v28 }
 0x2e4   :  { %v1274_v27 = vsel %vm80_vm0, %v1225_v29, 0.0  ;;  %v1111_v30 = vpop.f32.mrf.mxu1  ;;  %v1256_v47 = vsel %vm80_vm0, %v1215_v42, 0.0 }
 0x2e5   :  { %v1275_v35 = vadd.f32 %v1274_v27, %v1273_v24  ;;  %v1228_v36 = vmul.f32 %v2544_v11, %v1111_v30  ;;  %v1257_v20 = vadd.f32 %v1256_v47, %v1255_v50  ;;  %v1325_v30 = vmul.f32 %v2139_v12, %v1324_v26 }
 0x2e7   :  { %v2607_v38 = vadd.f32 %v1275_v35, %v2560_v33  ;;  %v1279_v18 = vsel %vm80_vm0, %v1228_v36, 0.0  ;;  %v1326_v36 = vadd.f32 %v2139_v12, %v1325_v30 }
 0x2e8   :  { %v1280_v43 = vadd.f32 %v1279_v18, %v1278_v32 }
 0x2e9   :  { %v892_v39 = vpop.f32.mrf.mxu3  ;;  %v1178_v40 = vpop.f32.mrf.mxu2  ;;  %v1313_v41 = vsel %vm80_vm0, %v2607_v38, 0.0 }
 0x2ea   :  { %1314 = vadd.xlane.f32.xlu1 %v1313_v41  ;;  %v1216_v44 = vmul.f32 %v2544_v11, %v892_v39  ;;  %v1230_v62 = vmul.f32 %v2542_v10, %v1178_v40  ;;  %v2651_v41 = vsel %vm1327_vm2, %v2139_v12, %v1326_v36 }
 0x2ec   :  { %v1114_v45 = vpop.f32.mrf.mxu1  ;;  %v1258_v51 = vsel %vm80_vm0, %v1216_v44, 0.0  ;;  %v1283_v5 = vsel %vm80_vm0, %v1230_v62, 0.0 }
 0x2ed   :  { %v1229_v46 = vmul.f32 %v2551_v25, %v1114_v45  ;;  %v1259_v57 = vadd.f32 %v1258_v51, %v1257_v20 }
 0x2ef   :  { %v1281_v48 = vsel %vm80_vm0, %v1229_v46, 0.0 }
 0x2f0   :  { %v1282_v52 = vadd.f32 %v1281_v48, %v1280_v43 }
 0x2f1   :  { %v895_v53 = vpop.f32.mrf.mxu3  ;;  %v1181_v54 = vpop.f32.mrf.mxu2 }
 0x2f2   :  { %v1217_v55 = vmul.f32 %v2551_v25, %v895_v53  ;;  %v2622_v56 = vadd.f32 %v1282_v52, %v2560_v33  ;;  %v1231_v63 = vmul.f32 %v2539_v9, %v1181_v54 }
 0x2f4   :  { %v1260_v59 = vsel %vm80_vm0, %v1217_v55, 0.0  ;;  %v1316_v60 = vsel %vm80_vm0, %v2622_v56, 0.0  ;;  %v1284_v58 = vsel %vm80_vm0, %v1231_v63, 0.0 }
 0x2f5   :  { %v1261_v61 = vadd.f32 %v1260_v59, %v1259_v57  ;;  %1317 = vadd.xlane.f32.xlu1 %v1316_v60  ;;  %v1285_v8 = vadd.f32 %v1284_v58, %v1283_v5 }
 0x2f7   :  { %v2630_v1 = vadd.f32 %v1261_v61, %v2560_v33 }
 0x2f9   :  { %v959_v21 = vpop.f32.mrf.mxu3  ;;  %v1184_v2 = vpop.f32.mrf.mxu2  ;;  %v1307_v3 = vsel %vm80_vm0, %v2630_v1, 0.0 }
 0x2fa   :  { %v1232_v7 = vmul.f32 %v2544_v11, %v1184_v2  ;;  %1308 = vadd.xlane.f32.xlu2 %v1307_v3  ;;  %v1218_v31 = vmul.f32 %v2542_v10, %v959_v21 }
 0x2fc   :  { %v1286_v6 = vsel %vm80_vm0, %v1232_v7, 0.0  ;;  %v1262_v32 = vsel %vm80_vm0, %v1218_v31, 0.0  ;;  %v1502_v7 = vld [vmem:[#allocation5 + $0x18] sm:$0xff] }
 0x2fd   :  { %v1287_v13 = vadd.f32 %v1286_v6, %v1285_v8  ;;  %1540 = vmatpush.msrb.mxu3 %v1502_v7  ;;  %v1501_v6 = vld [vmem:[#allocation5 + $0x10] sm:$0xff] }
 0x2ff   :  { %1541 = vmatpush.msrb.mxu3 %v1501_v6 }
 0x301   :  { %v962_v14 = vpop.f32.mrf.mxu3  ;;  %v1187_v22 = vpop.f32.mrf.mxu2 }
 0x302   :  { %v1233_v16 = vmul.f32 %v2551_v25, %v1187_v22  ;;  %v1219_v27 = vmul.f32 %v2539_v9, %v962_v14  ;;  %v1499_v22 = vld [vmem:[#allocation5] sm:$0xff] }
 0x304   :  { %v1288_v19 = vsel %vm80_vm0, %v1233_v16, 0.0  ;;  %v1263_v35 = vsel %vm80_vm0, %v1219_v27, 0.0 }
 0x305   :  { %v1289_v24 = vadd.f32 %v1288_v19, %v1287_v13  ;;  %v1264_v39 = vadd.f32 %v1263_v35, %v1262_v32  ;;  %v1500_v13 = vld [vmem:[#allocation5 + $0x8] sm:$0xff] }
 0x306   :  { %1542 = vmatpush.msrb.mxu3 %v1500_v13 }
 0x307   :  { %v2641_v28 = vadd.f32 %v1289_v24, %v2560_v33 }
 0x308   :  { %1543 = vmatpush.msrb.mxu3 %v1499_v22 }
 0x309   :  { %v965_v15 = vpop.f32.mrf.mxu3  ;;  %v1319_v29 = vsel %vm80_vm0, %v2641_v28, 0.0 }
 0x30a   :  { %1320 = vadd.xlane.f32.xlu1 %v1319_v29  ;;  %v1220_v23 = vmul.f32 %v2544_v11, %v965_v15 }
 0x30c   :  { %v1265_v18 = vsel %vm80_vm0, %v1220_v23, 0.0 }
 0x30d   :  { %v1300_v42 = vpop.xlane.xlu2 %1299  ;;  %v1266_v37 = vadd.f32 %v1265_v18, %v1264_v39 }
 0x30e   :  { %v1329_v11 = vmul.f32 %v2651_v41, %v1300_v42 }
 0x310   :  { %v2658_v45 = vsub.f32 %v2563_v34, %v1329_v11 }
 0x311   :  { %v968_v40 = vpop.f32.mrf.mxu3 }
 0x312   :  { %v1221_v9 = vmul.f32 %v2551_v25, %v968_v40  ;;  %v1345_v47 = vmul.f32 %v2658_v45, %v2658_v45 }
 0x314   :  { %v1267_v10 = vsel %vm80_vm0, %v1221_v9, 0.0  ;;  %v1353_v48 = vsel %vm80_vm0, %v1345_v47, 0.0 }
 0x315   :  { %v1268_v43 = vadd.f32 %v1267_v10, %v1266_v37 }
 0x317   :  { %v1294_v44 = vadd.f32 %v1268_v43, %v2560_v33 }
 0x319   :  { %v1310_v46 = vsel %vm80_vm0, %v1294_v44, 0.0 }
 0x31a   :  { %1311 = vadd.xlane.f32.xlu2 %v1310_v46 }
 0x322   :  { %1354 = vadd.xlane.f32.xlu2 %v1353_v48 }
 0x32d   :  { %v1303_v25 = vpop.xlane.xlu0 %1302 }
 0x32e   :  { %v1330_v50 = vmul.f32 %v2651_v41, %v1303_v25 }
 0x330   :  { %v2666_v51 = vsub.f32 %v2576_v49, %v1330_v50 }
 0x332   :  { %v1346_v33 = vmul.f32 %v2666_v51, %v2666_v51 }
 0x334   :  { %v1356_v34 = vsel %vm80_vm0, %v1346_v33, 0.0 }
 0x335   :  { %1357 = vadd.xlane.f32.xlu2 %v1356_v34 }
 0x34d   :  { %v1306_v52 = vpop.xlane.xlu1 %1305 }
 0x34e   :  { %v1331_v20 = vmul.f32 %v2651_v41, %v1306_v52 }
 0x350   :  { %v2673_v53 = vsub.f32 %v2591_v0, %v1331_v20 }
 0x352   :  { %v1347_v54 = vmul.f32 %v2673_v53, %v2673_v53 }
 0x354   :  { %v1359_v55 = vsel %vm80_vm0, %v1347_v54, 0.0 }
 0x355   :  { %1360 = vadd.xlane.f32.xlu0 %v1359_v55 }
 0x35d   :  { %v1315_v49 = vpop.xlane.xlu1 %1314 }
 0x35e   :  { %v1334_v57 = vmul.f32 %v2651_v41, %v1315_v49 }
 0x360   :  { %v2680_v59 = vsub.f32 %v2607_v38, %v1334_v57 }
 0x362   :  { %v1350_v60 = vmul.f32 %v2680_v59, %v2680_v59 }
 0x364   :  { %v1368_v61 = vsel %vm80_vm0, %v1350_v60, 0.0 }
 0x365   :  { %1369 = vadd.xlane.f32.xlu0 %v1368_v61 }
 0x368   :  { %v1318_v0 = vpop.xlane.xlu1 %1317 }
 0x369   :  { %v1335_v21 = vmul.f32 %v2651_v41, %v1318_v0 }
 0x36b   :  { %v2693_v38 = vsub.f32 %v2622_v56, %v1335_v21 }
 0x36d   :  { %v1309_v62 = vpop.xlane.xlu2 %1308  ;;  %v1351_v5 = vmul.f32 %v2693_v38, %v2693_v38 }
 0x36e   :  { %v1332_v63 = vmul.f32 %v2651_v41, %v1309_v62 }
 0x36f   :  { %v1371_v58 = vsel %vm80_vm0, %v1351_v5, 0.0 }
 0x370   :  { %v2688_v2 = vsub.f32 %v2630_v1, %v1332_v63 }
 0x372   :  { %v1348_v3 = vmul.f32 %v2688_v2, %v2688_v2 }
 0x374   :  { %v1362_v4 = vsel %vm80_vm0, %v1348_v3, 0.0 }
 0x375   :  { %1363 = vadd.xlane.f32.xlu2 %v1362_v4 }
 0x37d   :  { %1372 = vadd.xlane.f32.xlu2 %v1371_v58  ;;  %v1321_v8 = vpop.xlane.xlu1 %1320 }
 0x37e   :  { %v1336_v56 = vmul.f32 %v2651_v41, %v1321_v8 }
 0x380   :  { %v2706_v17 = vsub.f32 %v2641_v28, %v1336_v56  ;;  %v2716_v28 = vld [vmem:[%s2926_s4] sm:$0x7f]  ;;  %s2255_s4 = smov [#allocation7]  }
 0x381   :  { %v2720_v40 = vperm.slane %v2716_v28, 3  ;;  %v2724_v10 = vperm.slane %v2716_v28, 4  ;;  %s1949_s6 = sshll.u32 %s2255_s4, 4  ;;  %s1950_s6 = int_to_ptr.vmem [resolvable:$true] %s1949_s6 }
 0x382   :  { %v1352_v29 = vmul.f32 %v2706_v17, %v2706_v17 }
 0x384   :  { %v1374_v27 = vsel %vm80_vm0, %v1352_v29, 0.0 }
 0x38d   :  { %v1312_v1 = vpop.xlane.xlu2 %1311 }
 0x38e   :  { %v1333_v12 = vmul.f32 %v2651_v41, %v1312_v1 }
 0x390   :  { %v2701_v14 = vsub.f32 %v1294_v44, %v1333_v12 }
 0x392   :  { %v1349_v16 = vmul.f32 %v2701_v14, %v2701_v14 }
 0x394   :  { %v1365_v19 = vsel %vm80_vm0, %v1349_v16, 0.0 }
 0x395   :  { %1366 = vadd.xlane.f32.xlu1 %v1365_v19  ;;  %v1355_v24 = vpop.xlane.xlu2 %1354 }
 0x396   :  { %v1377_v26 = vmul.f32 %v1355_v24, %v2651_v41 }
 0x398   :  { %v1385_v15 = vadd.f32 1e-05, %v1377_v26 }
 0x39a   :  { %2140 = vrsqrt.f32 %v1385_v15  ;;  %vm1399_vm4 = vweird.f32 %v1385_v15 }
 0x39d   :  { %1375 = vadd.xlane.f32.xlu1 %v1374_v27 }
 0x3a0   :  { %v2141_v30 = vpop.eup %2140 }
 0x3a1   :  { %v1394_v31 = vmul.f32 %v2141_v30, %v1385_v15  ;;  %vm1400_vm3 = vweird.f32 %v2141_v30 }
 0x3a2   :  { %vm1401_vm5 = vmor %vm1399_vm4, %vm1400_vm3 }
 0x3a3   :  { %v1395_v23 = vmul.f32 %v2141_v30, %v1394_v31 }
 0x3a5   :  { %v1396_v35 = vmul.f32 0.5, %v1395_v23 }
 0x3a7   :  { %v1397_v36 = vsub.f32 1.5, %v1396_v35 }
 0x3a8   :  { %v1358_v32 = vpop.xlane.xlu2 %1357 }
 0x3a9   :  { %v1398_v18 = vmul.f32 %v2141_v30, %v1397_v36  ;;  %v1378_v39 = vmul.f32 %v1358_v32, %v2651_v41  ;;  %v1581_v36 = vld [vmem:[#allocation5 + $0x38] sm:$0xff] }
 0x3aa   :  { %1619 = vmatpush.msrb.mxu0 %v1581_v36 }
 0x3ab   :  { %v1402_v42 = vsel %vm1401_vm5, %v2141_v30, %v1398_v18  ;;  %v1386_v9 = vadd.f32 1e-05, %v1378_v39 }
 0x3ac   :  { %v1473_v37 = vmul.f32 %v1402_v42, %v2658_v45 }
 0x3ad   :  { %2142 = vrsqrt.f32 %v1386_v9  ;;  %vm1409_vm7 = vweird.f32 %v1386_v9 }
 0x3ae   :  { %v1482_v11 = vmul.f32 %v2720_v40, %v1473_v37 }
 0x3b0   :  { %v2728_v43 = vadd.f32 %v2724_v10, %v1482_v11 }
 0x3b2   :  { %2053 = vmatmul.msk.f32.vlgmr.msrb.gmra.mxu3 %vm80_vm0, %v2728_v43 }
 0x3b3   :  { %v2143_v44 = vpop.eup %2142 }
 0x3b4   :  { %v1404_v46 = vmul.f32 %v2143_v44, %v1386_v9  ;;  %vm1410_vm6 = vweird.f32 %v2143_v44 }
 0x3b5   :  { %vm1411_vm8 = vmor %vm1409_vm7, %vm1410_vm6 }
 0x3b6   :  { %v1405_v47 = vmul.f32 %v2143_v44, %v1404_v46 }
 0x3b8   :  { %v1406_v48 = vmul.f32 0.5, %v1405_v47  ;;  %v1580_v47 = vld [vmem:[#allocation5 + $0x30] sm:$0xff] }
 0x3b9   :  { %1620 = vmatpush.msrb.mxu0 %v1580_v47  ;;  %v1582_v47 = vperm.slane %v2716_v28, 1 }
 0x3ba   :  { %v1407_v25 = vsub.f32 1.5, %v1406_v48 }
 0x3bc   :  { %v1408_v50 = vmul.f32 %v2143_v44, %v1407_v25 }
 0x3be   :  { %v1412_v45 = vsel %vm1411_vm8, %v2143_v44, %v1408_v50  ;;  %v1579_v50 = vld [vmem:[#allocation5 + $0x28] sm:$0xff] }
 0x3bf   :  { %v1474_v33 = vmul.f32 %v1412_v45, %v2666_v51  ;;  %1621 = vmatpush.msrb.mxu0 %v1579_v50 }
 0x3c1   :  { %v1483_v34 = vmul.f32 %v2720_v40, %v1474_v33 }
 0x3c3   :  { %v2735_v52 = vadd.f32 %v2724_v10, %v1483_v34  ;;  %v1578_v34 = vld [vmem:[#allocation5 + $0x20] sm:$0xff] }
 0x3c4   :  { %1622 = vmatpush.msrb.mxu0 %v1578_v34 }
 0x3c5   :  { %2054 = vmatmul.msk.f32.gmra.mxu3 %vm80_vm0, %v2735_v52 }
 0x3c8   :  { %v1361_v20 = vpop.xlane.xlu0 %1360 }
 0x3c9   :  { %v1379_v54 = vmul.f32 %v1361_v20, %v2651_v41 }
 0x3cb   :  { %v1387_v55 = vadd.f32 1e-05, %v1379_v54 }
 0x3cd   :  { %2144 = vrsqrt.f32 %v1387_v55  ;;  %vm1419_vm10 = vweird.f32 %v1387_v55 }
 0x3d3   :  { %v2145_v49 = vpop.eup %2144 }
 0x3d4   :  { %v1414_v57 = vmul.f32 %v2145_v49, %v1387_v55  ;;  %vm1420_vm9 = vweird.f32 %v2145_v49 }
 0x3d5   :  { %vm1421_vm11 = vmor %vm1419_vm10, %vm1420_vm9 }
 0x3d6   :  { %v1415_v60 = vmul.f32 %v2145_v49, %v1414_v57 }
 0x3d8   :  { %v1416_v61 = vmul.f32 0.5, %v1415_v60  ;;  %v1370_v6 = vpop.xlane.xlu0 %1369 }
 0x3da   :  { %v1417_v0 = vsub.f32 1.5, %v1416_v61 }
 0x3dc   :  { %v1418_v51 = vmul.f32 %v2145_v49, %v1417_v0 }
 0x3de   :  { %v1422_v62 = vsel %vm1421_vm11, %v2145_v49, %v1418_v51 }
 0x3df   :  { %v1475_v63 = vmul.f32 %v1422_v62, %v2673_v53  ;;  %v1382_v53 = vmul.f32 %v1370_v6, %v2651_v41 }
 0x3e1   :  { %v1484_v21 = vmul.f32 %v2720_v40, %v1475_v63  ;;  %v1390_v22 = vadd.f32 1e-05, %v1382_v53 }
 0x3e3   :  { %v2743_v3 = vadd.f32 %v2724_v10, %v1484_v21  ;;  %vm1449_vm4 = vweird.f32 %v1390_v22 }
 0x3e5   :  { %2055 = vmatmul.msk.f32.gmra.mxu3 %vm80_vm0, %v2743_v3 }
 0x3e8   :  { %v1364_v4 = vpop.xlane.xlu2 %1363 }
 0x3e9   :  { %v1380_v5 = vmul.f32 %v1364_v4, %v2651_v41 }
 0x3eb   :  { %v1388_v58 = vadd.f32 1e-05, %v1380_v5 }
 0x3ed   :  { %2146 = vrsqrt.f32 %v1388_v58  ;;  %vm1429_vm13 = vweird.f32 %v1388_v58 }
 0x3ee   :  { %2148 = vrsqrt.f32 %v1390_v22 }
 0x3f0   :  { %v1373_v24 = vpop.xlane.xlu2 %1372 }
 0x3f1   :  { %v1383_v15 = vmul.f32 %v1373_v24, %v2651_v41 }
 0x3f3   :  { %v2147_v7 = vpop.eup %2146  ;;  %v1391_v27 = vadd.f32 1e-05, %v1383_v15 }
 0x3f4   :  { %v1424_v8 = vmul.f32 %v2147_v7, %v1388_v58  ;;  %vm1430_vm12 = vweird.f32 %v2147_v7  ;;  %v2149_v30 = vpop.eup %2148 }
 0x3f5   :  { %vm1431_vm14 = vmor %vm1429_vm13, %vm1430_vm12  ;;  %v1444_v35 = vmul.f32 %v2149_v30, %v1390_v22  ;;  %2150 = vrsqrt.f32 %v1391_v27  ;;  %vm1450_vm1 = vweird.f32 %v2149_v30  ;;  %vm1459_vm7 = vweird.f32 %v1391_v27 }
 0x3f6   :  { %v1425_v1 = vmul.f32 %v2147_v7, %v1424_v8  ;;  %vm1451_vm5 = vmor %vm1449_vm4, %vm1450_vm1 }
 0x3f7   :  { %v1445_v32 = vmul.f32 %v2149_v30, %v1444_v35 }
 0x3f8   :  { %v1426_v12 = vmul.f32 0.5, %v1425_v1 }
 0x3f9   :  { %v1446_v37 = vmul.f32 0.5, %v1445_v32  ;;  %v1659_v32 = vld [vmem:[#allocation5 + $0x50] sm:$0xff] }
 0x3fa   :  { %v1427_v13 = vsub.f32 1.5, %v1426_v12 }
 0x3fb   :  { %v2151_v39 = vpop.eup %2150  ;;  %v1447_v25 = vsub.f32 1.5, %v1446_v37 }
 0x3fc   :  { %v1428_v56 = vmul.f32 %v2147_v7, %v1427_v13  ;;  %v1454_v44 = vmul.f32 %v2151_v39, %v1391_v27  ;;  %vm1460_vm6 = vweird.f32 %v2151_v39 }
 0x3fd   :  { %v1448_v55 = vmul.f32 %v2149_v30, %v1447_v25  ;;  %vm1461_vm8 = vmor %vm1459_vm7, %vm1460_vm6 }
 0x3fe   :  { %v1432_v16 = vsel %vm1431_vm14, %v2147_v7, %v1428_v56  ;;  %v1455_v45 = vmul.f32 %v2151_v39, %v1454_v44  ;;  %v1503_v56 = vperm.slane %v2716_v28, 0 }
 0x3ff   :  { %v1476_v19 = vmul.f32 %v1432_v16, %v2688_v2  ;;  %v1452_v51 = vsel %vm1451_vm5, %v2149_v30, %v1448_v55 }
 0x400   :  { %v1456_v49 = vmul.f32 0.5, %v1455_v45  ;;  %v1478_v4 = vmul.f32 %v1452_v51, %v2680_v59 }
 0x401   :  { %v1485_v26 = vmul.f32 %v2720_v40, %v1476_v19 }
 0x402   :  { %v1457_v62 = vsub.f32 1.5, %v1456_v49 }
 0x403   :  { %v2753_v29 = vadd.f32 %v2724_v10, %v1485_v26 }
 0x404   :  { %v1458_v58 = vmul.f32 %v2151_v39, %v1457_v62 }
 0x405   :  { %2056 = vmatmul.msk.f32.gmra.mxu3 %vm80_vm0, %v2753_v29 }
 0x406   :  { %v1462_v8 = vsel %vm1461_vm8, %v2151_v39, %v1458_v58  ;;  %v1657_v39 = vld [vmem:[#allocation5 + $0x40] sm:$0xff] }
 0x407   :  { %v1479_v6 = vmul.f32 %v1462_v8, %v2693_v38 }
 0x408   :  { %v1367_v31 = vpop.xlane.xlu1 %1366 }
 0x409   :  { %v1381_v23 = vmul.f32 %v1367_v31, %v2651_v41  ;;  %v1488_v53 = vmul.f32 %v2720_v40, %v1479_v6  ;;  %v1661_v6 = vperm.slane %v2716_v28, 2 }
 0x40b   :  { %v1389_v2 = vadd.f32 1e-05, %v1381_v23  ;;  %v2778_v16 = vadd.f32 %v2724_v10, %v1488_v53 }
 0x40d   :  { %2152 = vrsqrt.f32 %v1389_v2  ;;  %vm1439_vm2 = vweird.f32 %v1389_v2 }
 0x410   :  { %v1376_v18 = vpop.xlane.xlu1 %1375 }
 0x411   :  { %v1384_v42 = vmul.f32 %v1376_v18, %v2651_v41  ;;  %v1658_v18 = vld [vmem:[#allocation5 + $0x48] sm:$0xff] }
 0x413   :  { %v2153_v9 = vpop.eup %2152  ;;  %v1392_v11 = vadd.f32 1e-05, %v1384_v42 }
 0x414   :  { %v1434_v46 = vmul.f32 %v2153_v9, %v1389_v2  ;;  %vm1440_vm15 = vweird.f32 %v2153_v9 }
 0x415   :  { %2154 = vrsqrt.f32 %v1392_v11  ;;  %vm1441_vm3 = vmor %vm1439_vm2, %vm1440_vm15  ;;  %vm1469_vm10 = vweird.f32 %v1392_v11 }
 0x416   :  { %v1435_v48 = vmul.f32 %v2153_v9, %v1434_v46 }
 0x418   :  { %v1436_v33 = vmul.f32 0.5, %v1435_v48 }
 0x41a   :  { %v1437_v20 = vsub.f32 1.5, %v1436_v33 }
 0x41b   :  { %v2155_v54 = vpop.eup %2154 }
 0x41c   :  { %v1438_v57 = vmul.f32 %v2153_v9, %v1437_v20  ;;  %v1464_v60 = vmul.f32 %v2155_v54, %v1392_v11  ;;  %vm1470_vm9 = vweird.f32 %v2155_v54 }
 0x41d   :  { %vm1471_vm11 = vmor %vm1469_vm10, %vm1470_vm9 }
 0x41e   :  { %v1442_v61 = vsel %vm1441_vm3, %v2153_v9, %v1438_v57  ;;  %v1465_v63 = vmul.f32 %v2155_v54, %v1464_v60 }
 0x41f   :  { %v1477_v0 = vmul.f32 %v1442_v61, %v2701_v14  ;;  %v1487_v14 = vmul.f32 %v2720_v40, %v1478_v4 }
 0x420   :  { %v1466_v7 = vmul.f32 0.5, %v1465_v63 }
 0x421   :  { %v1486_v21 = vmul.f32 %v2720_v40, %v1477_v0  ;;  %v2770_v12 = vadd.f32 %v2724_v10, %v1487_v14 }
 0x422   :  { %v1467_v1 = vsub.f32 1.5, %v1466_v7 }
 0x423   :  { %v2763_v5 = vadd.f32 %v2724_v10, %v1486_v21 }
 0x424   :  { %v1468_v59 = vmul.f32 %v2155_v54, %v1467_v1 }
 0x425   :  { %2057 = vmatmul.msk.f32.gmra.mxu3 %vm80_vm0, %v2763_v5 }
 0x426   :  { %v1472_v13 = vsel %vm1471_vm11, %v2155_v54, %v1468_v59 }
 0x427   :  { %v1480_v22 = vmul.f32 %v1472_v13, %v2706_v17 }
 0x429   :  { %v1489_v24 = vmul.f32 %v2720_v40, %v1480_v22 }
 0x42b   :  { %v2785_v15 = vadd.f32 %v2724_v10, %v1489_v24  ;;  %v1660_v10 = vld [vmem:[#allocation5 + $0x58] sm:$0xff] }
 0x42c   :  { %1698 = vmatpush.msra.mxu1 %v1660_v10 }
 0x42d   :  { %2058 = vmatmul.msk.f32.gmra.mxu3 %vm80_vm0, %v2770_v12 }
 0x42e   :  { %1699 = vmatpush.msra.mxu1 %v1659_v32 }
 0x430   :  { %1700 = vmatpush.msra.mxu1 %v1658_v18 }
 0x432   :  { %1701 = vmatpush.msra.mxu1 %v1657_v39 }
 0x435   :  { %v1545_v38 = vpop.f32.mrf.mxu3  ;;  %2059 = vmatmul.msk.f32.gmra.mxu3 %vm80_vm0, %v2778_v16 }
 0x436   :  { %v1546_v19 = vadd.f32 %v1545_v38, %v1503_v56 }
 0x438   :  { %v1569_v26 = vmax.f32 %v1546_v19, 0.0 }
 0x43a   :  { %2061 = vmatmul.msk.f32.vlgmr.msrb.gmra.mxu0 %vm80_vm0, %v1569_v26 }
 0x43d   :  { %2060 = vmatmul.msk.f32.gmra.mxu3 %vm80_vm0, %v2785_v15 }
 0x448   :  { %v1548_v17 = vpop.f32.mrf.mxu3 }
 0x449   :  { %v1549_v27 = vadd.f32 %v1548_v17, %v1503_v56 }
 0x44b   :  { %v1570_v30 = vmax.f32 %v1549_v27, 0.0 }
 0x44d   :  { %2062 = vmatmul.msk.f32.gmra.mxu0 %vm80_vm0, %v1570_v30 }
 0x468   :  { %v1551_v31 = vpop.f32.mrf.mxu3 }
 0x469   :  { %v1552_v23 = vadd.f32 %v1551_v31, %v1503_v56 }
 0x46b   :  { %v1571_v35 = vmax.f32 %v1552_v23, 0.0 }
 0x46d   :  { %2063 = vmatmul.msk.f32.gmra.mxu0 %vm80_vm0, %v1571_v35 }
 0x488   :  { %v1554_v40 = vpop.f32.mrf.mxu3 }
 0x489   :  { %v1555_v2 = vadd.f32 %v1554_v40, %v1503_v56 }
 0x48b   :  { %v1572_v36 = vmax.f32 %v1555_v2, 0.0 }
 0x48d   :  { %2064 = vmatmul.msk.f32.gmra.mxu0 %vm80_vm0, %v1572_v36 }
 0x4a8   :  { %v1557_v42 = vpop.f32.mrf.mxu3 }
 0x4a9   :  { %v1558_v9 = vadd.f32 %v1557_v42, %v1503_v56 }
 0x4ab   :  { %v1573_v37 = vmax.f32 %v1558_v9, 0.0 }
 0x4ad   :  { %2065 = vmatmul.msk.f32.gmra.mxu0 %vm80_vm0, %v1573_v37 }
 0x4b0   :  { %v1560_v11 = vpop.f32.mrf.mxu3 }
 0x4b1   :  { %v1561_v44 = vadd.f32 %v1560_v11, %v1503_v56 }
 0x4b3   :  { %v1574_v46 = vmax.f32 %v1561_v44, 0.0 }
 0x4b5   :  { %2066 = vmatmul.msk.f32.gmra.mxu0 %vm80_vm0, %v1574_v46 }
 0x4b7   :  { %v1624_v48 = vpop.f32.mrf.mxu0 }
 0x4b8   :  { %v1625_v25 = vadd.f32 %v1624_v48, %v1582_v47  ;;  %v1563_v50 = vpop.f32.mrf.mxu3 }
 0x4b9   :  { %v1564_v45 = vadd.f32 %v1563_v50, %v1503_v56 }
 0x4ba   :  { %v1648_v33 = vmax.f32 %v1625_v25, 0.0 }
 0x4bb   :  { %v1575_v34 = vmax.f32 %v1564_v45, 0.0 }
 0x4bc   :  { %2069 = vmatmul.msk.f32.vlgmr.msra.gmra.mxu1 %vm80_vm0, %v1648_v33 }
 0x4bd   :  { %2067 = vmatmul.msk.f32.gmra.mxu0 %vm80_vm0, %v1575_v34 }
 0x4c0   :  { %v1566_v20 = vpop.f32.mrf.mxu3 }
 0x4c1   :  { %v1567_v54 = vadd.f32 %v1566_v20, %v1503_v56 }
 0x4c3   :  { %v1576_v55 = vmax.f32 %v1567_v54, 0.0 }
 0x4c5   :  { %2068 = vmatmul.msk.f32.gmra.mxu0 %vm80_vm0, %v1576_v55 }
 0x4ca   :  { %v1627_v49 = vpop.f32.mrf.mxu0 }
 0x4cb   :  { %v1628_v57 = vadd.f32 %v1627_v49, %v1582_v47 }
 0x4cd   :  { %v1649_v60 = vmax.f32 %v1628_v57, 0.0 }
 0x4cf   :  { %2070 = vmatmul.msk.f32.gmra.mxu1 %vm80_vm0, %v1649_v60 }
 0x4ea   :  { %v1630_v61 = vpop.f32.mrf.mxu0 }
 0x4eb   :  { %v1631_v0 = vadd.f32 %v1630_v61, %v1582_v47 }
 0x4ed   :  { %v1650_v51 = vmax.f32 %v1631_v0, 0.0 }
 0x4ef   :  { %2071 = vmatmul.msk.f32.gmra.mxu1 %vm80_vm0, %v1650_v51 }
 0x50a   :  { %v1633_v62 = vpop.f32.mrf.mxu0 }
 0x50b   :  { %v1634_v63 = vadd.f32 %v1633_v62, %v1582_v47 }
 0x50d   :  { %v1651_v21 = vmax.f32 %v1634_v63, 0.0 }
 0x50f   :  { %2072 = vmatmul.msk.f32.gmra.mxu1 %vm80_vm0, %v1651_v21 }
 0x52a   :  { %v1636_v4 = vpop.f32.mrf.mxu0 }
 0x52b   :  { %v1637_v58 = vadd.f32 %v1636_v4, %v1582_v47 }
 0x52d   :  { %v1652_v7 = vmax.f32 %v1637_v58, 0.0 }
 0x52f   :  { %2073 = vmatmul.msk.f32.gmra.mxu1 %vm80_vm0, %v1652_v7 }
 0x532   :  { %v1639_v14 = vpop.f32.mrf.mxu0 }
 0x533   :  { %v1640_v8 = vadd.f32 %v1639_v14, %v1582_v47 }
 0x535   :  { %v1653_v1 = vmax.f32 %v1640_v8, 0.0 }
 0x537   :  { %2074 = vmatmul.msk.f32.gmra.mxu1 %vm80_vm0, %v1653_v1 }
 0x539   :  { %v1703_v59 = vpop.f32.mrf.mxu1 }
 0x53a   :  { %v1704_v53 = vadd.f32 %v1703_v59, %v1661_v6  ;;  %v1642_v13 = vpop.f32.mrf.mxu0 }
 0x53b   :  { %v1643_v56 = vadd.f32 %v1642_v13, %v1582_v47 }
 0x53c   :  { %v1727_v22 = vmax.f32 %v1704_v53, 0.0 }
 0x53d   :  { %v1654_v38 = vmax.f32 %v1643_v56, 0.0 }
 0x53e   :  { %v1735_v19 = vadd.f32 %v1727_v22, %v2728_v43 }
 0x53f   :  { %2075 = vmatmul.msk.f32.gmra.mxu1 %vm80_vm0, %v1654_v38 }
 0x540   :  { %v1743_v24 = vsel %vm80_vm0, %v1735_v19, 0.0 }
 0x541   :  { %1744 = vadd.xlane.f32.xlu0 %v1743_v24 }
 0x542   :  { %v1645_v26 = vpop.f32.mrf.mxu0 }
 0x543   :  { %v1646_v17 = vadd.f32 %v1645_v26, %v1582_v47 }
 0x545   :  { %v1655_v27 = vmax.f32 %v1646_v17, 0.0 }
 0x547   :  { %2076 = vmatmul.msk.f32.gmra.mxu1 %vm80_vm0, %v1655_v27 }
 0x54c   :  { %v1706_v30 = vpop.f32.mrf.mxu1 }
 0x54d   :  { %v1707_v31 = vadd.f32 %v1706_v30, %v1661_v6 }
 0x54f   :  { %v1728_v23 = vmax.f32 %v1707_v31, 0.0 }
 0x551   :  { %v1736_v35 = vadd.f32 %v1728_v23, %v2735_v52 }
 0x553   :  { %v1746_v40 = vsel %vm80_vm0, %v1736_v35, 0.0 }
 0x554   :  { %1747 = vadd.xlane.f32.xlu2 %v1746_v40 }
 0x56c   :  { %v1709_v2 = vpop.f32.mrf.mxu1 }
 0x56d   :  { %v1710_v43 = vadd.f32 %v1709_v2, %v1661_v6 }
 0x56f   :  { %v1729_v36 = vmax.f32 %v1710_v43, 0.0 }
 0x571   :  { %v1737_v10 = vadd.f32 %v1729_v36, %v2743_v3 }
 0x573   :  { %v1749_v32 = vsel %vm80_vm0, %v1737_v10, 0.0 }
 0x574   :  { %1750 = vadd.xlane.f32.xlu1 %v1749_v32 }
 0x58c   :  { %v1712_v18 = vpop.f32.mrf.mxu1 }
 0x58d   :  { %v1713_v39 = vadd.f32 %v1712_v18, %v1661_v6 }
 0x58f   :  { %v1730_v42 = vmax.f32 %v1713_v39, 0.0 }
 0x591   :  { %v1738_v9 = vadd.f32 %v1730_v42, %v2753_v29 }
 0x593   :  { %v1752_v37 = vsel %vm80_vm0, %v1738_v9, 0.0 }
 0x594   :  { %1753 = vadd.xlane.f32.xlu0 %v1752_v37 }
 0x5ac   :  { %v1715_v52 = vpop.f32.mrf.mxu1 }
 0x5ad   :  { %v1716_v11 = vadd.f32 %v1715_v52, %v1661_v6 }
 0x5af   :  { %v1731_v44 = vmax.f32 %v1716_v11, 0.0 }
 0x5b1   :  { %v1739_v46 = vadd.f32 %v1731_v44, %v2763_v5 }
 0x5b3   :  { %v1755_v47 = vsel %vm80_vm0, %v1739_v46, 0.0 }
 0x5b4   :  { %v1745_v48 = vpop.xlane.xlu0 %1744  ;;  %v1718_v3 = vpop.f32.mrf.mxu1  ;;  %1756 = vadd.xlane.f32.xlu2 %v1755_v47 }
 0x5b5   :  { %v1719_v25 = vadd.f32 %v1718_v3, %v1661_v6  ;;  %v1767_v50 = vmul.f32 %v1745_v48, %v2651_v41 }
 0x5b7   :  { %v1732_v45 = vmax.f32 %v1719_v25, 0.0  ;;  %v2818_v29 = vsub.f32 %v1735_v19, %v1767_v50 }
 0x5b9   :  { %v1740_v33 = vadd.f32 %v1732_v45, %v2770_v12  ;;  %v1783_v5 = vmul.f32 %v2818_v29, %v2818_v29 }
 0x5bb   :  { %v1758_v34 = vsel %vm80_vm0, %v1740_v33, 0.0  ;;  %v1791_v57 = vsel %vm80_vm0, %v1783_v5, 0.0 }
 0x5bc   :  { %1759 = vadd.xlane.f32.xlu1 %v1758_v34  ;;  %v1721_v20 = vpop.f32.mrf.mxu1 }
 0x5bd   :  { %v1722_v54 = vadd.f32 %v1721_v20, %v1661_v6 }
 0x5bf   :  { %v1733_v55 = vmax.f32 %v1722_v54, 0.0  ;;  %v2876_v54 = vperm.slane %v2716_v28, 6 }
 0x5c1   :  { %v1741_v49 = vadd.f32 %v1733_v55, %v2778_v16 }
 0x5c3   :  { %v1761_v60 = vsel %vm80_vm0, %v1741_v49, 0.0 }
 0x5c4   :  { %1792 = vadd.xlane.f32.xlu1 %v1791_v57  ;;  %v1724_v61 = vpop.f32.mrf.mxu1  ;;  %1762 = vadd.xlane.f32.xlu0 %v1761_v60 }
 0x5c5   :  { %v1725_v12 = vadd.f32 %v1724_v61, %v1661_v6 }
 0x5c7   :  { %v1734_v0 = vmax.f32 %v1725_v12, 0.0  ;;  %v1748_v51 = vpop.xlane.xlu2 %1747 }
 0x5c8   :  { %v1768_v62 = vmul.f32 %v1748_v51, %v2651_v41 }
 0x5c9   :  { %v1742_v63 = vadd.f32 %v1734_v0, %v2785_v15 }
 0x5ca   :  { %v2828_v21 = vsub.f32 %v1736_v35, %v1768_v62 }
 0x5cb   :  { %v1764_v4 = vsel %vm80_vm0, %v1742_v63, 0.0 }
 0x5cc   :  { %1765 = vadd.xlane.f32.xlu2 %v1764_v4  ;;  %v1784_v16 = vmul.f32 %v2828_v21, %v2828_v21 }
 0x5ce   :  { %v1794_v58 = vsel %vm80_vm0, %v1784_v16, 0.0 }
 0x5cf   :  { %1795 = vadd.xlane.f32.xlu0 %v1794_v58 }
 0x5e7   :  { %v1751_v7 = vpop.xlane.xlu1 %1750 }
 0x5e8   :  { %v1769_v14 = vmul.f32 %v1751_v7, %v2651_v41 }
 0x5ea   :  { %v2835_v8 = vsub.f32 %v1737_v10, %v1769_v14 }
 0x5ec   :  { %v1785_v1 = vmul.f32 %v2835_v8, %v2835_v8 }
 0x5ee   :  { %v1797_v15 = vsel %vm80_vm0, %v1785_v1, 0.0 }
 0x5ef   :  { %1798 = vadd.xlane.f32.xlu2 %v1797_v15 }
 0x607   :  { %v1754_v6 = vpop.xlane.xlu0 %1753 }
 0x608   :  { %v1770_v59 = vmul.f32 %v1754_v6, %v2651_v41 }
 0x60a   :  { %v2841_v53 = vsub.f32 %v1738_v9, %v1770_v59 }
 0x60c   :  { %v1786_v13 = vmul.f32 %v2841_v53, %v2841_v53 }
 0x60e   :  { %v1800_v56 = vsel %vm80_vm0, %v1786_v13, 0.0 }
 0x60f   :  { %1801 = vadd.xlane.f32.xlu1 %v1800_v56 }
 0x627   :  { %v1757_v22 = vpop.xlane.xlu2 %1756 }
 0x628   :  { %v1771_v38 = vmul.f32 %v1757_v22, %v2651_v41 }
 0x62a   :  { %v2847_v19 = vsub.f32 %v1739_v46, %v1771_v38 }
 0x62c   :  { %v1787_v24 = vmul.f32 %v2847_v19, %v2847_v19 }
 0x62e   :  { %v1803_v26 = vsel %vm80_vm0, %v1787_v24, 0.0 }
 0x62f   :  { %v1760_v17 = vpop.xlane.xlu1 %1759  ;;  %1804 = vadd.xlane.f32.xlu0 %v1803_v26 }
 0x630   :  { %v1772_v27 = vmul.f32 %v1760_v17, %v2651_v41 }
 0x632   :  { %v2853_v30 = vsub.f32 %v1740_v33, %v1772_v27  ;;  %v2873_v33 = vperm.slane %v2716_v28, 5 }
 0x634   :  { %v1788_v31 = vmul.f32 %v2853_v30, %v2853_v30 }
 0x636   :  { %v1806_v23 = vsel %vm80_vm0, %v1788_v31, 0.0 }
 0x637   :  { %v1793_v35 = vpop.xlane.xlu1 %1792  ;;  %1807 = vadd.xlane.f32.xlu2 %v1806_v23  ;;  %v1763_v40 = vpop.xlane.xlu0 %1762 }
 0x638   :  { %v1815_v2 = vmul.f32 %v1793_v35, %v2651_v41  ;;  %v1773_v43 = vmul.f32 %v1763_v40, %v2651_v41 }
 0x63a   :  { %v1823_v36 = vadd.f32 1e-05, %v1815_v2  ;;  %v2860_v10 = vsub.f32 %v1741_v49, %v1773_v43 }
 0x63c   :  { %2156 = vrsqrt.f32 %v1823_v36  ;;  %v1789_v32 = vmul.f32 %v2860_v10, %v2860_v10  ;;  %vm1837_vm13 = vweird.f32 %v1823_v36 }
 0x63e   :  { %v1809_v18 = vsel %vm80_vm0, %v1789_v32, 0.0 }
 0x63f   :  { %1810 = vadd.xlane.f32.xlu1 %v1809_v18  ;;  %v1766_v39 = vpop.xlane.xlu2 %1765 }
 0x640   :  { %v1774_v42 = vmul.f32 %v1766_v39, %v2651_v41 }
 0x642   :  { %v2157_v9 = vpop.eup %2156  ;;  %v2866_v37 = vsub.f32 %v1742_v63, %v1774_v42  ;;  %v1796_v52 = vpop.xlane.xlu0 %1795 }
 0x643   :  { %v1832_v11 = vmul.f32 %v2157_v9, %v1823_v36  ;;  %v1816_v44 = vmul.f32 %v1796_v52, %v2651_v41  ;;  %vm1838_vm12 = vweird.f32 %v2157_v9 }
 0x644   :  { %v1790_v46 = vmul.f32 %v2866_v37, %v2866_v37  ;;  %vm1839_vm14 = vmor %vm1837_vm13, %vm1838_vm12 }
 0x645   :  { %v1833_v47 = vmul.f32 %v2157_v9, %v1832_v11  ;;  %v1824_v48 = vadd.f32 1e-05, %v1816_v44 }
 0x646   :  { %v1812_v3 = vsel %vm80_vm0, %v1790_v46, 0.0 }
 0x647   :  { %v1834_v25 = vmul.f32 0.5, %v1833_v47  ;;  %2158 = vrsqrt.f32 %v1824_v48  ;;  %1813 = vadd.xlane.f32.xlu0 %v1812_v3  ;;  %vm1847_vm1 = vweird.f32 %v1824_v48 }
 0x649   :  { %v1835_v50 = vsub.f32 1.5, %v1834_v25 }
 0x64b   :  { %v1836_v45 = vmul.f32 %v2157_v9, %v1835_v50 }
 0x64d   :  { %v2159_v34 = vpop.eup %2158  ;;  %v1840_v20 = vsel %vm1839_vm14, %v2157_v9, %v1836_v45 }
 0x64e   :  { %v1911_v55 = vmul.f32 %v1840_v20, %v2818_v29  ;;  %v1842_v5 = vmul.f32 %v2159_v34, %v1824_v48  ;;  %vm1848_vm15 = vweird.f32 %v2159_v34 }
 0x64f   :  { %vm1849_vm2 = vmor %vm1847_vm1, %vm1848_vm15 }
 0x650   :  { %v1920_v49 = vmul.f32 %v2873_v33, %v1911_v55  ;;  %v1843_v57 = vmul.f32 %v2159_v34, %v1842_v5 }
 0x652   :  { %v1929_v60 = vadd.f32 %v2876_v54, %v1920_v49  ;;  %v1844_v61 = vmul.f32 0.5, %v1843_v57 }
 0x654   :  { %1937 = vst.msk [vmem:[#allocation7] sm:$0xff] %vm80_vm0, %v1929_v60  ;;  %v1845_v12 = vsub.f32 1.5, %v1844_v61 }
 0x656   :  { %v1846_v0 = vmul.f32 %v2159_v34, %v1845_v12 }
 0x658   :  { %v1850_v51 = vsel %vm1849_vm2, %v2159_v34, %v1846_v0 }
 0x659   :  { %v1912_v28 = vmul.f32 %v1850_v51, %v2828_v21 }
 0x65b   :  { %v1921_v62 = vmul.f32 %v2873_v33, %v1912_v28 }
 0x65d   :  { %v1930_v29 = vadd.f32 %v2876_v54, %v1921_v62 }
 0x65f   :  { %1938 = vst.msk [vmem:[#allocation7 + $0x8] sm:$0xff] %vm80_vm0, %v1930_v29 }
 0x662   :  { %v1799_v63 = vpop.xlane.xlu2 %1798 }
 0x663   :  { %v1817_v4 = vmul.f32 %v1799_v63, %v2651_v41 }
 0x665   :  { %v1825_v16 = vadd.f32 1e-05, %v1817_v4 }
 0x667   :  { %2160 = vrsqrt.f32 %v1825_v16  ;;  %vm1857_vm4 = vweird.f32 %v1825_v16 }
 0x66d   :  { %v2161_v58 = vpop.eup %2160 }
 0x66e   :  { %v1852_v7 = vmul.f32 %v2161_v58, %v1825_v16  ;;  %vm1858_vm3 = vweird.f32 %v2161_v58 }
 0x66f   :  { %vm1859_vm5 = vmor %vm1857_vm4, %vm1858_vm3 }
 0x670   :  { %v1853_v14 = vmul.f32 %v2161_v58, %v1852_v7 }
 0x672   :  { %v1854_v1 = vmul.f32 0.5, %v1853_v14 }
 0x674   :  { %v1855_v15 = vsub.f32 1.5, %v1854_v1 }
 0x676   :  { %v1856_v6 = vmul.f32 %v2161_v58, %v1855_v15 }
 0x678   :  { %v1860_v21 = vsel %vm1859_vm5, %v2161_v58, %v1856_v6 }
 0x679   :  { %v1913_v59 = vmul.f32 %v1860_v21, %v2835_v8 }
 0x67b   :  { %v1922_v13 = vmul.f32 %v2873_v33, %v1913_v59 }
 0x67d   :  { %v1931_v56 = vadd.f32 %v2876_v54, %v1922_v13 }
 0x67f   :  { %1939 = vst.msk [vmem:[#allocation7 + $0x10] sm:$0xff] %vm80_vm0, %v1931_v56 }
 0x682   :  { %v1802_v22 = vpop.xlane.xlu1 %1801 }
 0x683   :  { %v1818_v38 = vmul.f32 %v1802_v22, %v2651_v41 }
 0x685   :  { %v1826_v24 = vadd.f32 1e-05, %v1818_v38 }
 0x687   :  { %2162 = vrsqrt.f32 %v1826_v24  ;;  %vm1867_vm7 = vweird.f32 %v1826_v24 }
 0x68d   :  { %v2163_v26 = vpop.eup %2162 }
 0x68e   :  { %v1862_v17 = vmul.f32 %v2163_v26, %v1826_v24  ;;  %vm1868_vm6 = vweird.f32 %v2163_v26 }
 0x68f   :  { %vm1869_vm8 = vmor %vm1867_vm7, %vm1868_vm6 }
 0x690   :  { %v1863_v27 = vmul.f32 %v2163_v26, %v1862_v17 }
 0x692   :  { %v1864_v31 = vmul.f32 0.5, %v1863_v27 }
 0x694   :  { %v1865_v23 = vsub.f32 1.5, %v1864_v31 }
 0x696   :  { %v1866_v35 = vmul.f32 %v2163_v26, %v1865_v23 }
 0x698   :  { %v1870_v8 = vsel %vm1869_vm8, %v2163_v26, %v1866_v35 }
 0x699   :  { %v1914_v40 = vmul.f32 %v1870_v8, %v2841_v53 }
 0x69b   :  { %v1923_v2 = vmul.f32 %v2873_v33, %v1914_v40 }
 0x69d   :  { %v1932_v43 = vadd.f32 %v2876_v54, %v1923_v2 }
 0x69f   :  { %1940 = vst.msk [vmem:[#allocation7 + $0x18] sm:$0xff] %vm80_vm0, %v1932_v43 }
 0x6a2   :  { %v1805_v36 = vpop.xlane.xlu0 %1804 }
 0x6a3   :  { %v1819_v32 = vmul.f32 %v1805_v36, %v2651_v41 }
 0x6a5   :  { %v1827_v18 = vadd.f32 1e-05, %v1819_v32 }
 0x6a7   :  { %2164 = vrsqrt.f32 %v1827_v18  ;;  %vm1877_vm10 = vweird.f32 %v1827_v18 }
 0x6aa   :  { %v1808_v39 = vpop.xlane.xlu2 %1807 }
 0x6ab   :  { %v1820_v42 = vmul.f32 %v1808_v39, %v2651_v41 }
 0x6ad   :  { %v2165_v9 = vpop.eup %2164  ;;  %v1828_v52 = vadd.f32 1e-05, %v1820_v42 }
 0x6ae   :  { %v1872_v11 = vmul.f32 %v2165_v9, %v1827_v18  ;;  %vm1878_vm9 = vweird.f32 %v2165_v9 }
 0x6af   :  { %2166 = vrsqrt.f32 %v1828_v52  ;;  %vm1879_vm11 = vmor %vm1877_vm10, %vm1878_vm9  ;;  %vm1887_vm13 = vweird.f32 %v1828_v52 }
 0x6b0   :  { %v1873_v44 = vmul.f32 %v2165_v9, %v1872_v11 }
 0x6b2   :  { %v1874_v53 = vmul.f32 0.5, %v1873_v44  ;;  %v1811_v46 = vpop.xlane.xlu1 %1810 }
 0x6b3   :  { %v1821_v47 = vmul.f32 %v1811_v46, %v2651_v41 }
 0x6b4   :  { %v1875_v48 = vsub.f32 1.5, %v1874_v53 }
 0x6b5   :  { %v2167_v3 = vpop.eup %2166  ;;  %v1829_v25 = vadd.f32 1e-05, %v1821_v47 }
 0x6b6   :  { %v1876_v50 = vmul.f32 %v2165_v9, %v1875_v48  ;;  %v1882_v45 = vmul.f32 %v2167_v3, %v1828_v52  ;;  %vm1888_vm12 = vweird.f32 %v2167_v3 }
 0x6b7   :  { %2168 = vrsqrt.f32 %v1829_v25  ;;  %vm1889_vm14 = vmor %vm1887_vm13, %vm1888_vm12  ;;  %vm1897_vm1 = vweird.f32 %v1829_v25 }
 0x6b8   :  { %v1880_v34 = vsel %vm1879_vm11, %v2165_v9, %v1876_v50  ;;  %v1883_v20 = vmul.f32 %v2167_v3, %v1882_v45 }
 0x6b9   :  { %v1915_v55 = vmul.f32 %v1880_v34, %v2847_v19 }
 0x6ba   :  { %v1884_v5 = vmul.f32 0.5, %v1883_v20  ;;  %v1814_v49 = vpop.xlane.xlu0 %1813 }
 0x6bb   :  { %v1924_v57 = vmul.f32 %v2873_v33, %v1915_v55  ;;  %v1822_v60 = vmul.f32 %v1814_v49, %v2651_v41 }
 0x6bc   :  { %v1885_v61 = vsub.f32 1.5, %v1884_v5 }
 0x6bd   :  { %v2169_v12 = vpop.eup %2168  ;;  %v1933_v0 = vadd.f32 %v2876_v54, %v1924_v57  ;;  %v1830_v51 = vadd.f32 1e-05, %v1822_v60 }
 0x6be   :  { %v1886_v28 = vmul.f32 %v2167_v3, %v1885_v61  ;;  %v1892_v62 = vmul.f32 %v2169_v12, %v1829_v25  ;;  %vm1898_vm15 = vweird.f32 %v2169_v12 }
 0x6bf   :  { %1941 = vst.msk [vmem:[#allocation7 + $0x20] sm:$0xff] %vm80_vm0, %v1933_v0  ;;  %2170 = vrsqrt.f32 %v1830_v51  ;;  %vm1899_vm2 = vmor %vm1897_vm1, %vm1898_vm15  ;;  %vm1907_vm4 = vweird.f32 %v1830_v51 }
 0x6c0   :  { %v1890_v19 = vsel %vm1889_vm14, %v2167_v3, %v1886_v28  ;;  %v1893_v29 = vmul.f32 %v2169_v12, %v1892_v62 }
 0x6c1   :  { %v1916_v63 = vmul.f32 %v1890_v19, %v2853_v30 }
 0x6c2   :  { %v1894_v4 = vmul.f32 0.5, %v1893_v29 }
 0x6c3   :  { %v1925_v41 = vmul.f32 %v2873_v33, %v1916_v63 }
 0x6c4   :  { %v1895_v16 = vsub.f32 1.5, %v1894_v4 }
 0x6c5   :  { %v2171_v58 = vpop.eup %2170  ;;  %v1934_v7 = vadd.f32 %v2876_v54, %v1925_v41 }
 0x6c6   :  { %v1896_v14 = vmul.f32 %v2169_v12, %v1895_v16  ;;  %v1902_v1 = vmul.f32 %v2171_v58, %v1830_v51  ;;  %vm1908_vm3 = vweird.f32 %v2171_v58 }
 0x6c7   :  { %1942 = vst.msk [vmem:[#allocation7 + $0x28] sm:$0xff] %vm80_vm0, %v1934_v7  ;;  %vm1909_vm5 = vmor %vm1907_vm4, %vm1908_vm3 }
 0x6c8   :  { %v1900_v15 = vsel %vm1899_vm2, %v2169_v12, %v1896_v14  ;;  %v1903_v6 = vmul.f32 %v2171_v58, %v1902_v1 }
 0x6c9   :  { %v1917_v21 = vmul.f32 %v1900_v15, %v2860_v10 }
 0x6ca   :  { %v1904_v59 = vmul.f32 0.5, %v1903_v6 }
 0x6cb   :  { %v1926_v30 = vmul.f32 %v2873_v33, %v1917_v21 }
 0x6cc   :  { %v1905_v13 = vsub.f32 1.5, %v1904_v59 }
 0x6cd   :  { %v1935_v56 = vadd.f32 %v2876_v54, %v1926_v30 }
 0x6ce   :  { %v1906_v22 = vmul.f32 %v2171_v58, %v1905_v13 }
 0x6cf   :  { %1943 = vst.msk [vmem:[#allocation7 + $0x30] sm:$0xff] %vm80_vm0, %v1935_v56 }
 0x6d0   :  { %v1910_v38 = vsel %vm1909_vm5, %v2171_v58, %v1906_v22 }
 0x6d1   :  { %v1918_v24 = vmul.f32 %v1910_v38, %v2866_v37 }
 0x6d3   :  { %v1927_v10 = vmul.f32 %v2873_v33, %v1918_v24 }
 0x6d5   :  { %v1936_v26 = vadd.f32 %v2876_v54, %v1927_v10 }
 0x6d7   :  { %1944 = vst.msk [vmem:[#allocation7 + $0x38] sm:$0xff] %vm80_vm0, %v1936_v26 }
 0x6d8   :  { %1957 = dma.vmem_to_hbm [thread:$0]  %s1950_s6, 1024, %s1952_s9, [#allocation4], %s2251_s26, %s2251_s26, %s2252_s27  }
 0x6d9   :  { %2248 = dma.done.wait [#allocation4], 1024  }
 0x6da   :  { %2249 = vsyncadd [#allocation4], 4294966272 }
 0x6db   :  { %1962 = vsyncpa [#allocation3], 1 }
 0x6dc   :  { %1963 = vsyncpa [#allocation6], 1 }
 0x6dd   :  { %1964 = vsyncpa [#allocation4], 1 }

</bundles_post_ra>
